<compile_context>
chip_gen: v6e
topology: v6e:2x2x1
jax: 0.10.0
libtpu: 0.0.40
codegen_flags: <defaults>
</compile_context>

<pallas_src>
import numpy as np
import jax
import jax.numpy as jnp
from jax.experimental import pallas as pl
from jax.experimental.pallas import tpu as pltpu

LANE = 128
SUB = 8 * LANE          # 1024 cells = one full (8,128) f32 vreg per attribute row


def _make_yolo_loss_kernel(S, B, n_chunks):
    inv_s = 1.0 / float(S)
    # Row offsets inside the stacked input (attribute-major ordering).
    r_px, r_py, r_pw, r_ph, r_pc = 0, B, 2 * B, 3 * B, 4 * B
    r_cls = 5 * B
    r_tgtb = 5 * B + 20
    r_tgtc = 5 * B + 24
    r_mask = 5 * B + 44
    r_wno = 5 * B + 45

    def kernel(x_ref, out_ref, acc_cls, acc_no, acc_cn, acc_rg):
        i = pl.program_id(1)

        @pl.when(i == 0)
        def _init():
            acc_cls[...] = jnp.zeros_like(acc_cls)
            acc_no[...] = jnp.zeros_like(acc_no)
            acc_cn[...] = jnp.zeros_like(acc_cn)
            acc_rg[...] = jnp.zeros_like(acc_rg)

        # Static unrolled loop over 1024-cell chunks of this tile; every slice
        # is static and its sublane offset is a multiple of 8 (vreg aligned).
        for c in range(n_chunks):
            s0 = c * 8

            def rows(r0, n, _s0=s0):
                return x_ref[pl.ds(r0, n), pl.ds(_s0, 8), :]     # (n, 8, 128)

            px = rows(r_px, B)
            py = rows(r_py, B)
            pw = rows(r_pw, B)
            ph = rows(r_ph, B)
            pc = rows(r_pc, B)
            mask = rows(r_mask, 1)[0]        # (8,128), 1.0 where cell has object
            wno = rows(r_wno, B)             # no-object weights (bug-compatible)

            # --- class prediction loss: mask-weighted dense squared error ---
            dcls = rows(r_cls, 20) - rows(r_tgtc, 20)
            acc_cls[...] += jnp.sum(dcls * dcls, axis=0) * mask

            # --- no-object confidence loss (target confidence = 0) ---
            acc_no[...] += jnp.sum(wno * pc * pc, axis=0)

            # --- IoU of every candidate box vs the target (target is xyxy) ---
            tgtb = rows(r_tgtb, 4)
            tx1, ty1, tx2, ty2 = tgtb[0], tgtb[1], tgtb[2], tgtb[3]
            t_area = (tx2 - tx1) * (ty2 - ty1)

            cx = px * inv_s
            cy = py * inv_s
            hw = pw * 0.5
            hh = ph * 0.5
            px1 = cx - hw
            py1 = cy - hh
            px2 = cx + hw
            py2 = cy + hh
            iw = jnp.maximum(jnp.minimum(px2, tx2) - jnp.maximum(px1, tx1), 0.0)
            ih = jnp.maximum(jnp.minimum(py2, ty2) - jnp.maximum(py1, ty1), 0.0)
            inter = iw * ih                                        # (B, 8, 128)
            denom = (px2 - px1) * (py2 - py1) + t_area - inter

            # --- best-box selection, division-free (first max wins, as in
            #     torch.max): iou_b > iou_best  <=>  inter_b*den_best > inter_best*den_b
            b_int = inter[0]
            b_den = denom[0]
            bxs, bys, bws, bhs, bcs = px[0], py[0], pw[0], ph[0], pc[0]
            for b in range(1, B):
                better = inter[b] * b_den > b_int * denom[b]
                b_int = jnp.where(better, inter[b], b_int)
                b_den = jnp.where(better, denom[b], b_den)
                bxs = jnp.where(better, px[b], bxs)
                bys = jnp.where(better, py[b], bys)
                bws = jnp.where(better, pw[b], bws)
                bhs = jnp.where(better, ph[b], bhs)
                bcs = jnp.where(better, pc[b], bcs)

            # --- containing-object confidence loss (target = 1) ---
            dcf = bcs - 1.0
            acc_cn[...] += mask * dcf * dcf

            # --- regression loss (bug-compatible with the reference: pred xy
            #     vs target cols 0:2, sqrt(pred wh) vs sqrt(target cols 2:4)) ---
            center = (bxs - tx1) ** 2 + (bys - ty1) ** 2
            dim = ((jnp.sqrt(bws) - jnp.sqrt(tx2)) ** 2
                   + (jnp.sqrt(bhs) - jnp.sqrt(ty2)) ** 2)
            acc_rg[...] += jnp.where(mask > 0.0, center + dim, 0.0)

        # One lane-dense output row per parallel slice, written once.
        @pl.when(i == pl.num_programs(1) - 1)
        def _finalize():
            lane = jax.lax.broadcasted_iota(jnp.int32, (1, LANE), 1)
            row = (jnp.where(lane == 0, jnp.sum(acc_cls[...]), 0.0)
                   + jnp.where(lane == 1, jnp.sum(acc_no[...]), 0.0)
                   + jnp.where(lane == 2, jnp.sum(acc_cn[...]), 0.0)
                   + jnp.where(lane == 3, jnp.sum(acc_rg[...]), 0.0))
            out_ref[0] = row

    return kernel


def yolo_loss_pallas(pred_tensor, target_boxes, target_cls, has_object_map,
                     *, S, B, l_coord, l_noobj, tile_cells=8192):
    f32 = jnp.float32
    N = pred_tensor.shape[0]
    L = N * S * S
    C = B * 5 + 20
    ROWS = 5 * B + 20 + 4 + 20 + 1 + B          # 57 for B=2

    # ---- tiling / grid (tile = multiple of one full (8,128) vreg of cells) ----
    tile_cells = max(SUB, ((int(tile_cells) + SUB - 1) // SUB) * SUB)
    l_round = ((L + SUB - 1) // SUB) * SUB
    tl = min(tile_cells, l_round)
    n_tiles = -(-l_round // tl)
    g_par = 2 if n_tiles >= 2 else 1            # shards across TCs on v7x only
    g_inner = -(-n_tiles // g_par)
    n_tiles = g_par * g_inner
    l_pad = n_tiles * tl
    r_blocks = tl // LANE                        # sublane rows per grid tile
    n_chunks = r_blocks // 8

    # ---- one stacked, channels-first, lane-dense input: (ROWS, Lpad/128, 128)
    pred_flat = pred_tensor.reshape(L, C).astype(f32)
    # Box columns reordered attribute-major: x(B), y(B), w(B), h(B), conf(B).
    box_attr = (pred_flat[:, :5 * B].reshape(L, B, 5)
                .transpose(0, 2, 1).reshape(L, 5 * B))
    mask_f = has_object_map.reshape(L).astype(f32)
    # Reproduce the reference get_no_object_loss indexing exactly (repeat- vs
    # concat-ordering mismatch), gather-free: w(box b, cell l) = not_obj[(b*L+l)//B]
    wno = jnp.repeat(1.0 - mask_f, B).reshape(B, L).T            # (L, B)
    stacked = jnp.concatenate([
        box_attr,                                                # 5*B rows
        pred_flat[:, 5 * B:],                                    # 20 class rows
        target_boxes.reshape(L, 4).astype(f32),                  # 4 rows (xyxy)
        target_cls.reshape(L, 20).astype(f32),                   # 20 rows
        mask_f[:, None],                                         # 1 row
        wno,                                                     # B rows
    ], axis=1)                                                   # (L, ROWS)
    if l_pad != L:   # zero padding contributes nothing to any loss term
        stacked = jnp.pad(stacked, ((0, l_pad - L), (0, 0)))
    stacked = stacked.T.reshape(ROWS, l_pad // LANE, LANE)

    in_specs = [pl.BlockSpec((ROWS, r_blocks, LANE),
                             lambda p, i: (0, p * g_inner + i, 0))]
    out_specs = pl.BlockSpec((1, 1, LANE), lambda p, i: (p, 0, 0))

    # Double-buffered input + scratch + output, capped for v7x's 64 MiB VMEM.
    vmem_need = 2 * ROWS * tl * 4 + 4 * 8 * LANE * 4 + 2 * LANE * 4
    vmem_limit = int(min(64 * 1024 * 1024, max(2 * vmem_need, 8 * 1024 * 1024)))

    partials = pl.pallas_call(
        _make_yolo_loss_kernel(S, B, n_chunks),
        out_shape=jax.ShapeDtypeStruct((g_par, 1, LANE), f32),
        grid_spec=pltpu.PrefetchScalarGridSpec(
            num_scalar_prefetch=0,
            grid=(g_par, g_inner),
            in_specs=in_specs,
            out_specs=out_specs,
            scratch_shapes=[
                pltpu.VMEM((8, LANE), f32),   # class-loss partial
                pltpu.VMEM((8, LANE), f32),   # no-object partial
                pltpu.VMEM((8, LANE), f32),   # contain-conf partial
                pltpu.VMEM((8, LANE), f32),   # regression partial
            ]),
        compiler_params=pltpu.CompilerParams(
            dimension_semantics=("parallel", "arbitrary"),
            vmem_limit_bytes=vmem_limit),
    )(stacked)

    sums = jnp.sum(partials, axis=(0, 1))        # lanes 0..3 hold the 4 sums
    inv_n = 1.0 / N
    cls_loss = sums[0] * inv_n
    no_obj_loss = sums[1] * inv_n
    containing_obj_loss = sums[2] * inv_n
    reg_loss = sums[3] * inv_n
    total_loss = (cls_loss + l_noobj * no_obj_loss
                  + l_coord * reg_loss + containing_obj_loss)
    return {
        "total_loss": total_loss,
        "reg_loss": reg_loss,
        "containing_obj_loss": containing_obj_loss,
        "no_obj_loss": no_obj_loss,
        "cls_loss": cls_loss,
    }


def _reference_numpy(pred, tgt_boxes, tgt_cls, has_obj, S, B, l_coord, l_noobj):
    """Direct numpy port of the PyTorch module (loops + boolean gathers)."""
    pred = np.asarray(pred, np.float64)
    tgt_boxes = np.asarray(tgt_boxes, np.float64)
    tgt_cls = np.asarray(tgt_cls, np.float64)
    obj = np.asarray(has_obj, bool)
    N = pred.shape[0]
    inv_n = 1.0 / N

    pbl = [pred[..., i * 5:(i + 1) * 5] for i in range(B)]
    pred_cls = pred[..., B * 5:]

    cls_loss = np.sum(((pred_cls - tgt_cls) ** 2)[obj]) * inv_n

    not_obj = ~obj
    rep_mask = np.repeat(not_obj.reshape(-1), B)
    flat_conf = np.concatenate([pb[..., 4].reshape(-1) for pb in pbl])
    no_obj_loss = np.sum(flat_conf[rep_mask] ** 2) * inv_n

    pbl_o = [pb[obj] for pb in pbl]
    tb = tgt_boxes[obj].reshape(-1, 4)
    M = tb.shape[0]
    best_boxes = np.zeros((M, 5))
    for i in range(M):
        ious = []
        for b in range(B):
            bx, by, bw, bh = pbl_o[b][i, :4]
            cx, cy = bx / S, by / S
            p = np.array([cx - bw / 2, cy - bh / 2, cx + bw / 2, cy + bh / 2])
            t = tb[i]
            iw = max(min(p[2], t[2]) - max(p[0], t[0]), 0.0)
            ih = max(min(p[3], t[3]) - max(p[1], t[1]), 0.0)
            inter = iw * ih
            a1 = (p[2] - p[0]) * (p[3] - p[1])
            a2 = (t[2] - t[0]) * (t[3] - t[1])
            ious.append(inter / (a1 + a2 - inter))
        best_boxes[i] = pbl_o[int(np.argmax(ious))][i]

    containing_obj_loss = np.sum((best_boxes[:, 4] - 1.0) ** 2) * inv_n
    center = np.sum((best_boxes[:, :2] - tb[:, :2]) ** 2)
    dim = np.sum((np.sqrt(best_boxes[:, 2:4]) - np.sqrt(tb[:, 2:4])) ** 2)
    reg_loss = (center + dim) * inv_n
    total_loss = cls_loss + l_noobj * no_obj_loss + l_coord * reg_loss + containing_obj_loss
    return {
        "total_loss": total_loss,
        "reg_loss": reg_loss,
        "containing_obj_loss": containing_obj_loss,
        "no_obj_loss": no_obj_loss,
        "cls_loss": cls_loss,
    }


if __name__ == "__main__":
    N, S, B = 24, 14, 2
    l_coord, l_noobj = 5.0, 0.5

    key = jax.random.PRNGKey(0)
    k1, k2, k3, k4, k5 = jax.random.split(key, 5)

    pred_tensor = jax.random.uniform(k1, (N, S, S, B * 5 + 20),
                                     minval=0.05, maxval=0.95, dtype=jnp.float32)
    corner = jax.random.uniform(k2, (N, S, S, 2), minval=0.05, maxval=0.4,
                                dtype=jnp.float32)
    wh = jax.random.uniform(k3, (N, S, S, 2), minval=0.1, maxval=0.5,
                            dtype=jnp.float32)
    target_boxes = jnp.concatenate([corner, corner + wh], axis=-1)  # xyxy, positive
    target_cls = jax.random.uniform(k4, (N, S, S, 20), dtype=jnp.float32)
    has_object_map = jax.random.bernoulli(k5, 0.5, (N, S, S))

    # L = 4704 cells, tile_cells=2048 -> grid (2, 2), 2 in-tile compute chunks,
    # a fully padded tail tile: exercises the parallel axis, multi-step
    # accumulation, the chunk loop, padding, and the finalize path.
    out = yolo_loss_pallas(pred_tensor, target_boxes, target_cls, has_object_map,
                           S=S, B=B, l_coord=l_coord, l_noobj=l_noobj,
                           tile_cells=2048)
    out = jax.tree_util.tree_map(jax.block_until_ready, out)

    ref = _reference_numpy(pred_tensor, target_boxes, target_cls, has_object_map,
                           S, B, l_coord, l_noobj)

    for k in ref:
        np.testing.assert_allclose(np.asarray(out[k]), ref[k],
                                   rtol=3e-4, atol=1e-4)

    print("KERNEL_OK")
</pallas_src>

<mosaic_0001>
module attributes {stable_mosaic.version = 11 : i64} {
  func.func @kernel(%arg0: i32, %arg1: i32, %arg2: memref<57x16x128xf32, #tpu.memory_space<vmem>>, %arg3: memref<1x1x128xf32, #tpu.memory_space<vmem>>, %arg4: memref<8x128xf32, #tpu.memory_space<vmem>>, %arg5: memref<8x128xf32, #tpu.memory_space<vmem>>, %arg6: memref<8x128xf32, #tpu.memory_space<vmem>>, %arg7: memref<8x128xf32, #tpu.memory_space<vmem>>) attributes {dimension_semantics = [#tpu.dimension_semantics<parallel>, #tpu.dimension_semantics<arbitrary>], iteration_bounds = array<i64: 2, 2>, scalar_prefetch = 0 : i64, scratch_operands = 4 : i64, tpu.core_type = #tpu.core_type<tc>, window_params = [{transform_indices = @transform_0, window_bounds = array<i64: 57, 16, 128>}, {transform_indices = @transform_1, window_bounds = array<i64: 1, 1, 128>}]} {
    %c0_i32 = arith.constant 0 : i32
    %0 = arith.cmpi eq, %arg1, %c0_i32 : i32
    %1 = arith.extui %0 : i1 to i32
    %c0_i32_0 = arith.constant 0 : i32
    %2 = arith.cmpi ne, %1, %c0_i32_0 : i32
    scf.if %2 {
      %cst_105 = arith.constant 0.000000e+00 : f32
      %282 = vector.broadcast %cst_105 : f32 to vector<8x128xf32>
      %c0_106 = arith.constant 0 : index
      %c0_107 = arith.constant 0 : index
      %283 = vector.load %arg4[%c0_106, %c0_107] : memref<8x128xf32, #tpu.memory_space<vmem>>, vector<8x128xf32>
      tpu.vector_store %arg4[%c0_106, %c0_107], %282 {strides = array<i32>} : memref<8x128xf32, #tpu.memory_space<vmem>>, vector<8x128xf32>,
      %cst_108 = arith.constant 0.000000e+00 : f32
      %284 = vector.broadcast %cst_108 : f32 to vector<8x128xf32>
      %c0_109 = arith.constant 0 : index
      %c0_110 = arith.constant 0 : index
      %285 = vector.load %arg5[%c0_109, %c0_110] : memref<8x128xf32, #tpu.memory_space<vmem>>, vector<8x128xf32>
      tpu.vector_store %arg5[%c0_109, %c0_110], %284 {strides = array<i32>} : memref<8x128xf32, #tpu.memory_space<vmem>>, vector<8x128xf32>,
      %cst_111 = arith.constant 0.000000e+00 : f32
      %286 = vector.broadcast %cst_111 : f32 to vector<8x128xf32>
      %c0_112 = arith.constant 0 : index
      %c0_113 = arith.constant 0 : index
      %287 = vector.load %arg6[%c0_112, %c0_113] : memref<8x128xf32, #tpu.memory_space<vmem>>, vector<8x128xf32>
      tpu.vector_store %arg6[%c0_112, %c0_113], %286 {strides = array<i32>} : memref<8x128xf32, #tpu.memory_space<vmem>>, vector<8x128xf32>,
      %cst_114 = arith.constant 0.000000e+00 : f32
      %288 = vector.broadcast %cst_114 : f32 to vector<8x128xf32>
      %c0_115 = arith.constant 0 : index
      %c0_116 = arith.constant 0 : index
      %289 = vector.load %arg7[%c0_115, %c0_116] : memref<8x128xf32, #tpu.memory_space<vmem>>, vector<8x128xf32>
      tpu.vector_store %arg7[%c0_115, %c0_116], %288 {strides = array<i32>} : memref<8x128xf32, #tpu.memory_space<vmem>>, vector<8x128xf32>,
    } else {
    }
    %c0 = arith.constant 0 : index
    %c0_1 = arith.constant 0 : index
    %c0_2 = arith.constant 0 : index
    %3 = vector.load %arg2[%c0, %c0_1, %c0_2] : memref<57x16x128xf32, #tpu.memory_space<vmem>>, vector<2x8x128xf32>
    %c2 = arith.constant 2 : index
    %c0_3 = arith.constant 0 : index
    %c0_4 = arith.constant 0 : index
    %4 = vector.load %arg2[%c2, %c0_3, %c0_4] : memref<57x16x128xf32, #tpu.memory_space<vmem>>, vector<2x8x128xf32>
    %c4 = arith.constant 4 : index
    %c0_5 = arith.constant 0 : index
    %c0_6 = arith.constant 0 : index
    %5 = vector.load %arg2[%c4, %c0_5, %c0_6] : memref<57x16x128xf32, #tpu.memory_space<vmem>>, vector<2x8x128xf32>
    %c6 = arith.constant 6 : index
    %c0_7 = arith.constant 0 : index
    %c0_8 = arith.constant 0 : index
    %6 = vector.load %arg2[%c6, %c0_7, %c0_8] : memref<57x16x128xf32, #tpu.memory_space<vmem>>, vector<2x8x128xf32>
    %c8 = arith.constant 8 : index
    %c0_9 = arith.constant 0 : index
    %c0_10 = arith.constant 0 : index
    %7 = vector.load %arg2[%c8, %c0_9, %c0_10] : memref<57x16x128xf32, #tpu.memory_space<vmem>>, vector<2x8x128xf32>
    %c54 = arith.constant 54 : index
    %c0_11 = arith.constant 0 : index
    %c0_12 = arith.constant 0 : index
    %8 = vector.load %arg2[%c54, %c0_11, %c0_12] : memref<57x16x128xf32, #tpu.memory_space<vmem>>, vector<1x8x128xf32>
    %9 = vector.shape_cast %8 : vector<1x8x128xf32> to vector<8x128xf32>
    %c55 = arith.constant 55 : index
    %c0_13 = arith.constant 0 : index
    %c0_14 = arith.constant 0 : index
    %10 = vector.load %arg2[%c55, %c0_13, %c0_14] : memref<57x16x128xf32, #tpu.memory_space<vmem>>, vector<2x8x128xf32>
    %c10 = arith.constant 10 : index
    %c0_15 = arith.constant 0 : index
    %c0_16 = arith.constant 0 : index
    %11 = vector.load %arg2[%c10, %c0_15, %c0_16] : memref<57x16x128xf32, #tpu.memory_space<vmem>>, vector<20x8x128xf32>
    %c34 = arith.constant 34 : index
    %c0_17 = arith.constant 0 : index
    %c0_18 = arith.constant 0 : index
    %12 = vector.load %arg2[%c34, %c0_17, %c0_18] : memref<57x16x128xf32, #tpu.memory_space<vmem>>, vector<20x8x128xf32>
    %13 = arith.subf %11, %12 : vector<20x8x128xf32>
    %c0_19 = arith.constant 0 : index
    %c0_20 = arith.constant 0 : index
    %14 = vector.load %arg4[%c0_19, %c0_20] : memref<8x128xf32, #tpu.memory_space<vmem>>, vector<8x128xf32>
    %15 = arith.mulf %13, %13 : vector<20x8x128xf32>
    %cst = arith.constant dense<0.000000e+00> : vector<8x128xf32>
    %16 = vector.multi_reduction <add>, %15, %cst [0] : vector<20x8x128xf32> to vector<8x128xf32>
    %17 = arith.mulf %16, %9 : vector<8x128xf32>
    %18 = arith.addf %14, %17 : vector<8x128xf32>
    %c0_21 = arith.constant 0 : index
    %c0_22 = arith.constant 0 : index
    %19 = vector.load %arg4[%c0_21, %c0_22] : memref<8x128xf32, #tpu.memory_space<vmem>>, vector<8x128xf32>
    tpu.vector_store %arg4[%c0_21, %c0_22], %18 {strides = array<i32>} : memref<8x128xf32, #tpu.memory_space<vmem>>, vector<8x128xf32>,
    %c0_23 = arith.constant 0 : index
    %c0_24 = arith.constant 0 : index
    %20 = vector.load %arg5[%c0_23, %c0_24] : memref<8x128xf32, #tpu.memory_space<vmem>>, vector<8x128xf32>
    %21 = arith.mulf %10, %7 : vector<2x8x128xf32>
    %22 = arith.mulf %21, %7 : vector<2x8x128xf32>
    %cst_25 = arith.constant dense<0.000000e+00> : vector<8x128xf32>
    %23 = vector.multi_reduction <add>, %22, %cst_25 [0] : vector<2x8x128xf32> to vector<8x128xf32>
    %24 = arith.addf %20, %23 : vector<8x128xf32>
    %c0_26 = arith.constant 0 : index
    %c0_27 = arith.constant 0 : index
    %25 = vector.load %arg5[%c0_26, %c0_27] : memref<8x128xf32, #tpu.memory_space<vmem>>, vector<8x128xf32>
    tpu.vector_store %arg5[%c0_26, %c0_27], %24 {strides = array<i32>} : memref<8x128xf32, #tpu.memory_space<vmem>>, vector<8x128xf32>,
    %c30 = arith.constant 30 : index
    %c0_28 = arith.constant 0 : index
    %c0_29 = arith.constant 0 : index
    %26 = vector.load %arg2[%c30, %c0_28, %c0_29] : memref<57x16x128xf32, #tpu.memory_space<vmem>>, vector<4x8x128xf32>
    %27 = vector.extract_strided_slice %26 {offsets = [0, 0, 0], sizes = [1, 8, 128], strides = [1, 1, 1]} : vector<4x8x128xf32> to vector<1x8x128xf32>
    %28 = vector.shape_cast %27 : vector<1x8x128xf32> to vector<8x128xf32>
    %29 = vector.extract_strided_slice %26 {offsets = [1, 0, 0], sizes = [1, 8, 128], strides = [1, 1, 1]} : vector<4x8x128xf32> to vector<1x8x128xf32>
    %30 = vector.shape_cast %29 : vector<1x8x128xf32> to vector<8x128xf32>
    %31 = vector.extract_strided_slice %26 {offsets = [2, 0, 0], sizes = [1, 8, 128], strides = [1, 1, 1]} : vector<4x8x128xf32> to vector<1x8x128xf32>
    %32 = vector.shape_cast %31 : vector<1x8x128xf32> to vector<8x128xf32>
    %33 = vector.extract_strided_slice %26 {offsets = [3, 0, 0], sizes = [1, 8, 128], strides = [1, 1, 1]} : vector<4x8x128xf32> to vector<1x8x128xf32>
    %34 = vector.shape_cast %33 : vector<1x8x128xf32> to vector<8x128xf32>
    %35 = arith.subf %32, %28 : vector<8x128xf32>
    %36 = arith.subf %34, %30 : vector<8x128xf32>
    %37 = arith.mulf %35, %36 : vector<8x128xf32>
    %cst_30 = arith.constant 0.0714285746 : f32
    %38 = vector.broadcast %cst_30 : f32 to vector<2x8x128xf32>
    %39 = arith.mulf %3, %38 : vector<2x8x128xf32>
    %cst_31 = arith.constant 0.0714285746 : f32
    %40 = vector.broadcast %cst_31 : f32 to vector<2x8x128xf32>
    %41 = arith.mulf %4, %40 : vector<2x8x128xf32>
    %cst_32 = arith.constant 5.000000e-01 : f32
    %42 = vector.broadcast %cst_32 : f32 to vector<2x8x128xf32>
    %43 = arith.mulf %5, %42 : vector<2x8x128xf32>
    %cst_33 = arith.constant 5.000000e-01 : f32
    %44 = vector.broadcast %cst_33 : f32 to vector<2x8x128xf32>
    %45 = arith.mulf %6, %44 : vector<2x8x128xf32>
    %46 = arith.subf %39, %43 : vector<2x8x128xf32>
    %47 = arith.subf %41, %45 : vector<2x8x128xf32>
    %48 = arith.addf %39, %43 : vector<2x8x128xf32>
    %49 = arith.addf %41, %45 : vector<2x8x128xf32>
    %50 = vector.shape_cast %32 : vector<8x128xf32> to vector<1x8x128xf32>
    %51 = vector.broadcast %50 : vector<1x8x128xf32> to vector<2x8x128xf32>
    %52 = arith.minimumf %48, %51 : vector<2x8x128xf32>
    %53 = vector.shape_cast %28 : vector<8x128xf32> to vector<1x8x128xf32>
    %54 = vector.broadcast %53 : vector<1x8x128xf32> to vector<2x8x128xf32>
    %55 = arith.maximumf %46, %54 : vector<2x8x128xf32>
    %56 = arith.subf %52, %55 : vector<2x8x128xf32>
    %cst_34 = arith.constant 0.000000e+00 : f32
    %57 = vector.broadcast %cst_34 : f32 to vector<2x8x128xf32>
    %58 = arith.maximumf %56, %57 : vector<2x8x128xf32>
    %59 = vector.shape_cast %34 : vector<8x128xf32> to vector<1x8x128xf32>
    %60 = vector.broadcast %59 : vector<1x8x128xf32> to vector<2x8x128xf32>
    %61 = arith.minimumf %49, %60 : vector<2x8x128xf32>
    %62 = vector.shape_cast %30 : vector<8x128xf32> to vector<1x8x128xf32>
    %63 = vector.broadcast %62 : vector<1x8x128xf32> to vector<2x8x128xf32>
    %64 = arith.maximumf %47, %63 : vector<2x8x128xf32>
    %65 = arith.subf %61, %64 : vector<2x8x128xf32>
    %cst_35 = arith.constant 0.000000e+00 : f32
    %66 = vector.broadcast %cst_35 : f32 to vector<2x8x128xf32>
    %67 = arith.maximumf %65, %66 : vector<2x8x128xf32>
    %68 = arith.mulf %58, %67 : vector<2x8x128xf32>
    %69 = arith.subf %48, %46 : vector<2x8x128xf32>
    %70 = arith.subf %49, %47 : vector<2x8x128xf32>
    %71 = arith.mulf %69, %70 : vector<2x8x128xf32>
    %72 = vector.shape_cast %37 : vector<8x128xf32> to vector<1x8x128xf32>
    %73 = vector.broadcast %72 : vector<1x8x128xf32> to vector<2x8x128xf32>
    %74 = arith.addf %71, %73 : vector<2x8x128xf32>
    %75 = arith.subf %74, %68 : vector<2x8x128xf32>
    %76 = vector.extract_strided_slice %68 {offsets = [0, 0, 0], sizes = [1, 8, 128], strides = [1, 1, 1]} : vector<2x8x128xf32> to vector<1x8x128xf32>
    %77 = vector.shape_cast %76 : vector<1x8x128xf32> to vector<8x128xf32>
    %78 = vector.extract_strided_slice %75 {offsets = [0, 0, 0], sizes = [1, 8, 128], strides = [1, 1, 1]} : vector<2x8x128xf32> to vector<1x8x128xf32>
    %79 = vector.shape_cast %78 : vector<1x8x128xf32> to vector<8x128xf32>
    %80 = vector.extract_strided_slice %3 {offsets = [0, 0, 0], sizes = [1, 8, 128], strides = [1, 1, 1]} : vector<2x8x128xf32> to vector<1x8x128xf32>
    %81 = vector.shape_cast %80 : vector<1x8x128xf32> to vector<8x128xf32>
    %82 = vector.extract_strided_slice %4 {offsets = [0, 0, 0], sizes = [1, 8, 128], strides = [1, 1, 1]} : vector<2x8x128xf32> to vector<1x8x128xf32>
    %83 = vector.shape_cast %82 : vector<1x8x128xf32> to vector<8x128xf32>
    %84 = vector.extract_strided_slice %5 {offsets = [0, 0, 0], sizes = [1, 8, 128], strides = [1, 1, 1]} : vector<2x8x128xf32> to vector<1x8x128xf32>
    %85 = vector.shape_cast %84 : vector<1x8x128xf32> to vector<8x128xf32>
    %86 = vector.extract_strided_slice %6 {offsets = [0, 0, 0], sizes = [1, 8, 128], strides = [1, 1, 1]} : vector<2x8x128xf32> to vector<1x8x128xf32>
    %87 = vector.shape_cast %86 : vector<1x8x128xf32> to vector<8x128xf32>
    %88 = vector.extract_strided_slice %7 {offsets = [0, 0, 0], sizes = [1, 8, 128], strides = [1, 1, 1]} : vector<2x8x128xf32> to vector<1x8x128xf32>
    %89 = vector.shape_cast %88 : vector<1x8x128xf32> to vector<8x128xf32>
    %90 = vector.extract_strided_slice %68 {offsets = [1, 0, 0], sizes = [1, 8, 128], strides = [1, 1, 1]} : vector<2x8x128xf32> to vector<1x8x128xf32>
    %91 = vector.shape_cast %90 : vector<1x8x128xf32> to vector<8x128xf32>
    %92 = arith.mulf %91, %79 : vector<8x128xf32>
    %93 = vector.extract_strided_slice %75 {offsets = [1, 0, 0], sizes = [1, 8, 128], strides = [1, 1, 1]} : vector<2x8x128xf32> to vector<1x8x128xf32>
    %94 = vector.shape_cast %93 : vector<1x8x128xf32> to vector<8x128xf32>
    %95 = arith.mulf %77, %94 : vector<8x128xf32>
    %96 = arith.cmpf ogt, %92, %95 : vector<8x128xf32>
    %97 = vector.extract_strided_slice %3 {offsets = [1, 0, 0], sizes = [1, 8, 128], strides = [1, 1, 1]} : vector<2x8x128xf32> to vector<1x8x128xf32>
    %98 = vector.shape_cast %97 : vector<1x8x128xf32> to vector<8x128xf32>
    %99 = arith.select %96, %98, %81 : vector<8x128xi1>, vector<8x128xf32>
    %100 = vector.extract_strided_slice %4 {offsets = [1, 0, 0], sizes = [1, 8, 128], strides = [1, 1, 1]} : vector<2x8x128xf32> to vector<1x8x128xf32>
    %101 = vector.shape_cast %100 : vector<1x8x128xf32> to vector<8x128xf32>
    %102 = arith.select %96, %101, %83 : vector<8x128xi1>, vector<8x128xf32>
    %103 = vector.extract_strided_slice %5 {offsets = [1, 0, 0], sizes = [1, 8, 128], strides = [1, 1, 1]} : vector<2x8x128xf32> to vector<1x8x128xf32>
    %104 = vector.shape_cast %103 : vector<1x8x128xf32> to vector<8x128xf32>
    %105 = arith.select %96, %104, %85 : vector<8x128xi1>, vector<8x128xf32>
    %106 = vector.extract_strided_slice %6 {offsets = [1, 0, 0], sizes = [1, 8, 128], strides = [1, 1, 1]} : vector<2x8x128xf32> to vector<1x8x128xf32>
    %107 = vector.shape_cast %106 : vector<1x8x128xf32> to vector<8x128xf32>
    %108 = arith.select %96, %107, %87 : vector<8x128xi1>, vector<8x128xf32>
    %109 = vector.extract_strided_slice %7 {offsets = [1, 0, 0], sizes = [1, 8, 128], strides = [1, 1, 1]} : vector<2x8x128xf32> to vector<1x8x128xf32>
    %110 = vector.shape_cast %109 : vector<1x8x128xf32> to vector<8x128xf32>
    %111 = arith.select %96, %110, %89 : vector<8x128xi1>, vector<8x128xf32>
    %cst_36 = arith.constant 1.000000e+00 : f32
    %112 = vector.broadcast %cst_36 : f32 to vector<8x128xf32>
    %113 = arith.subf %111, %112 : vector<8x128xf32>
    %c0_37 = arith.constant 0 : index
    %c0_38 = arith.constant 0 : index
    %114 = vector.load %arg6[%c0_37, %c0_38] : memref<8x128xf32, #tpu.memory_space<vmem>>, vector<8x128xf32>
    %115 = arith.mulf %9, %113 : vector<8x128xf32>
    %116 = arith.mulf %115, %113 : vector<8x128xf32>
    %117 = arith.addf %114, %116 : vector<8x128xf32>
    %c0_39 = arith.constant 0 : index
    %c0_40 = arith.constant 0 : index
    %118 = vector.load %arg6[%c0_39, %c0_40] : memref<8x128xf32, #tpu.memory_space<vmem>>, vector<8x128xf32>
    tpu.vector_store %arg6[%c0_39, %c0_40], %117 {strides = array<i32>} : memref<8x128xf32, #tpu.memory_space<vmem>>, vector<8x128xf32>,
    %119 = arith.subf %99, %28 : vector<8x128xf32>
    %120 = arith.mulf %119, %119 : vector<8x128xf32>
    %121 = arith.subf %102, %30 : vector<8x128xf32>
    %122 = arith.mulf %121, %121 : vector<8x128xf32>
    %123 = arith.addf %120, %122 : vector<8x128xf32>
    %124 = math.sqrt %105 : vector<8x128xf32>
    %125 = math.sqrt %32 : vector<8x128xf32>
    %126 = arith.subf %124, %125 : vector<8x128xf32>
    %127 = arith.mulf %126, %126 : vector<8x128xf32>
    %128 = math.sqrt %108 : vector<8x128xf32>
    %129 = math.sqrt %34 : vector<8x128xf32>
    %130 = arith.subf %128, %129 : vector<8x128xf32>
    %131 = arith.mulf %130, %130 : vector<8x128xf32>
    %132 = arith.addf %127, %131 : vector<8x128xf32>
    %c0_41 = arith.constant 0 : index
    %c0_42 = arith.constant 0 : index
    %133 = vector.load %arg7[%c0_41, %c0_42] : memref<8x128xf32, #tpu.memory_space<vmem>>, vector<8x128xf32>
    %cst_43 = arith.constant 0.000000e+00 : f32
    %134 = vector.broadcast %cst_43 : f32 to vector<8x128xf32>
    %135 = arith.cmpf ogt, %9, %134 : vector<8x128xf32>
    %136 = arith.addf %123, %132 : vector<8x128xf32>
    %cst_44 = arith.constant 0.000000e+00 : f32
    %137 = vector.broadcast %cst_44 : f32 to vector<8x128xf32>
    %138 = arith.select %135, %136, %137 : vector<8x128xi1>, vector<8x128xf32>
    %139 = arith.addf %133, %138 : vector<8x128xf32>
    %c0_45 = arith.constant 0 : index
    %c0_46 = arith.constant 0 : index
    %140 = vector.load %arg7[%c0_45, %c0_46] : memref<8x128xf32, #tpu.memory_space<vmem>>, vector<8x128xf32>
    tpu.vector_store %arg7[%c0_45, %c0_46], %139 {strides = array<i32>} : memref<8x128xf32, #tpu.memory_space<vmem>>, vector<8x128xf32>,
    %c0_47 = arith.constant 0 : index
    %c8_48 = arith.constant 8 : index
    %c0_49 = arith.constant 0 : index
    %141 = vector.load %arg2[%c0_47, %c8_48, %c0_49] : memref<57x16x128xf32, #tpu.memory_space<vmem>>, vector<2x8x128xf32>
    %c2_50 = arith.constant 2 : index
    %c8_51 = arith.constant 8 : index
    %c0_52 = arith.constant 0 : index
    %142 = vector.load %arg2[%c2_50, %c8_51, %c0_52] : memref<57x16x128xf32, #tpu.memory_space<vmem>>, vector<2x8x128xf32>
    %c4_53 = arith.constant 4 : index
    %c8_54 = arith.constant 8 : index
    %c0_55 = arith.constant 0 : index
    %143 = vector.load %arg2[%c4_53, %c8_54, %c0_55] : memref<57x16x128xf32, #tpu.memory_space<vmem>>, vector<2x8x128xf32>
    %c6_56 = arith.constant 6 : index
    %c8_57 = arith.constant 8 : index
    %c0_58 = arith.constant 0 : index
    %144 = vector.load %arg2[%c6_56, %c8_57, %c0_58] : memref<57x16x128xf32, #tpu.memory_space<vmem>>, vector<2x8x128xf32>
    %c8_59 = arith.constant 8 : index
    %c8_60 = arith.constant 8 : index
    %c0_61 = arith.constant 0 : index
    %145 = vector.load %arg2[%c8_59, %c8_60, %c0_61] : memref<57x16x128xf32, #tpu.memory_space<vmem>>, vector<2x8x128xf32>
    %c54_62 = arith.constant 54 : index
    %c8_63 = arith.constant 8 : index
    %c0_64 = arith.constant 0 : index
    %146 = vector.load %arg2[%c54_62, %c8_63, %c0_64] : memref<57x16x128xf32, #tpu.memory_space<vmem>>, vector<1x8x128xf32>
    %147 = vector.shape_cast %146 : vector<1x8x128xf32> to vector<8x128xf32>
    %c55_65 = arith.constant 55 : index
    %c8_66 = arith.constant 8 : index
    %c0_67 = arith.constant 0 : index
    %148 = vector.load %arg2[%c55_65, %c8_66, %c0_67] : memref<57x16x128xf32, #tpu.memory_space<vmem>>, vector<2x8x128xf32>
    %c10_68 = arith.constant 10 : index
    %c8_69 = arith.constant 8 : index
    %c0_70 = arith.constant 0 : index
    %149 = vector.load %arg2[%c10_68, %c8_69, %c0_70] : memref<57x16x128xf32, #tpu.memory_space<vmem>>, vector<20x8x128xf32>
    %c34_71 = arith.constant 34 : index
    %c8_72 = arith.constant 8 : index
    %c0_73 = arith.constant 0 : index
    %150 = vector.load %arg2[%c34_71, %c8_72, %c0_73] : memref<57x16x128xf32, #tpu.memory_space<vmem>>, vector<20x8x128xf32>
    %151 = arith.subf %149, %150 : vector<20x8x128xf32>
    %c0_74 = arith.constant 0 : index
    %c0_75 = arith.constant 0 : index
    %152 = vector.load %arg4[%c0_74, %c0_75] : memref<8x128xf32, #tpu.memory_space<vmem>>, vector<8x128xf32>
    %153 = arith.mulf %151, %151 : vector<20x8x128xf32>
    %cst_76 = arith.constant dense<0.000000e+00> : vector<8x128xf32>
    %154 = vector.multi_reduction <add>, %153, %cst_76 [0] : vector<20x8x128xf32> to vector<8x128xf32>
    %155 = arith.mulf %154, %147 : vector<8x128xf32>
    %156 = arith.addf %152, %155 : vector<8x128xf32>
    %c0_77 = arith.constant 0 : index
    %c0_78 = arith.constant 0 : index
    %157 = vector.load %arg4[%c0_77, %c0_78] : memref<8x128xf32, #tpu.memory_space<vmem>>, vector<8x128xf32>
    tpu.vector_store %arg4[%c0_77, %c0_78], %156 {strides = array<i32>} : memref<8x128xf32, #tpu.memory_space<vmem>>, vector<8x128xf32>,
    %c0_79 = arith.constant 0 : index
    %c0_80 = arith.constant 0 : index
    %158 = vector.load %arg5[%c0_79, %c0_80] : memref<8x128xf32, #tpu.memory_space<vmem>>, vector<8x128xf32>
    %159 = arith.mulf %148, %145 : vector<2x8x128xf32>
    %160 = arith.mulf %159, %145 : vector<2x8x128xf32>
    %cst_81 = arith.constant dense<0.000000e+00> : vector<8x128xf32>
    %161 = vector.multi_reduction <add>, %160, %cst_81 [0] : vector<2x8x128xf32> to vector<8x128xf32>
    %162 = arith.addf %158, %161 : vector<8x128xf32>
    %c0_82 = arith.constant 0 : index
    %c0_83 = arith.constant 0 : index
    %163 = vector.load %arg5[%c0_82, %c0_83] : memref<8x128xf32, #tpu.memory_space<vmem>>, vector<8x128xf32>
    tpu.vector_store %arg5[%c0_82, %c0_83], %162 {strides = array<i32>} : memref<8x128xf32, #tpu.memory_space<vmem>>, vector<8x128xf32>,
    %c30_84 = arith.constant 30 : index
    %c8_85 = arith.constant 8 : index
    %c0_86 = arith.constant 0 : index
    %164 = vector.load %arg2[%c30_84, %c8_85, %c0_86] : memref<57x16x128xf32, #tpu.memory_space<vmem>>, vector<4x8x128xf32>
    %165 = vector.extract_strided_slice %164 {offsets = [0, 0, 0], sizes = [1, 8, 128], strides = [1, 1, 1]} : vector<4x8x128xf32> to vector<1x8x128xf32>
    %166 = vector.shape_cast %165 : vector<1x8x128xf32> to vector<8x128xf32>
    %167 = vector.extract_strided_slice %164 {offsets = [1, 0, 0], sizes = [1, 8, 128], strides = [1, 1, 1]} : vector<4x8x128xf32> to vector<1x8x128xf32>
    %168 = vector.shape_cast %167 : vector<1x8x128xf32> to vector<8x128xf32>
    %169 = vector.extract_strided_slice %164 {offsets = [2, 0, 0], sizes = [1, 8, 128], strides = [1, 1, 1]} : vector<4x8x128xf32> to vector<1x8x128xf32>
    %170 = vector.shape_cast %169 : vector<1x8x128xf32> to vector<8x128xf32>
    %171 = vector.extract_strided_slice %164 {offsets = [3, 0, 0], sizes = [1, 8, 128], strides = [1, 1, 1]} : vector<4x8x128xf32> to vector<1x8x128xf32>
    %172 = vector.shape_cast %171 : vector<1x8x128xf32> to vector<8x128xf32>
    %173 = arith.subf %170, %166 : vector<8x128xf32>
    %174 = arith.subf %172, %168 : vector<8x128xf32>
    %175 = arith.mulf %173, %174 : vector<8x128xf32>
    %cst_87 = arith.constant 0.0714285746 : f32
    %176 = vector.broadcast %cst_87 : f32 to vector<2x8x128xf32>
    %177 = arith.mulf %141, %176 : vector<2x8x128xf32>
    %cst_88 = arith.constant 0.0714285746 : f32
    %178 = vector.broadcast %cst_88 : f32 to vector<2x8x128xf32>
    %179 = arith.mulf %142, %178 : vector<2x8x128xf32>
    %cst_89 = arith.constant 5.000000e-01 : f32
    %180 = vector.broadcast %cst_89 : f32 to vector<2x8x128xf32>
    %181 = arith.mulf %143, %180 : vector<2x8x128xf32>
    %cst_90 = arith.constant 5.000000e-01 : f32
    %182 = vector.broadcast %cst_90 : f32 to vector<2x8x128xf32>
    %183 = arith.mulf %144, %182 : vector<2x8x128xf32>
    %184 = arith.subf %177, %181 : vector<2x8x128xf32>
    %185 = arith.subf %179, %183 : vector<2x8x128xf32>
    %186 = arith.addf %177, %181 : vector<2x8x128xf32>
    %187 = arith.addf %179, %183 : vector<2x8x128xf32>
    %188 = vector.shape_cast %170 : vector<8x128xf32> to vector<1x8x128xf32>
    %189 = vector.broadcast %188 : vector<1x8x128xf32> to vector<2x8x128xf32>
    %190 = arith.minimumf %186, %189 : vector<2x8x128xf32>
    %191 = vector.shape_cast %166 : vector<8x128xf32> to vector<1x8x128xf32>
    %192 = vector.broadcast %191 : vector<1x8x128xf32> to vector<2x8x128xf32>
    %193 = arith.maximumf %184, %192 : vector<2x8x128xf32>
    %194 = arith.subf %190, %193 : vector<2x8x128xf32>
    %cst_91 = arith.constant 0.000000e+00 : f32
    %195 = vector.broadcast %cst_91 : f32 to vector<2x8x128xf32>
    %196 = arith.maximumf %194, %195 : vector<2x8x128xf32>
    %197 = vector.shape_cast %172 : vector<8x128xf32> to vector<1x8x128xf32>
    %198 = vector.broadcast %197 : vector<1x8x128xf32> to vector<2x8x128xf32>
    %199 = arith.minimumf %187, %198 : vector<2x8x128xf32>
    %200 = vector.shape_cast %168 : vector<8x128xf32> to vector<1x8x128xf32>
    %201 = vector.broadcast %200 : vector<1x8x128xf32> to vector<2x8x128xf32>
    %202 = arith.maximumf %185, %201 : vector<2x8x128xf32>
    %203 = arith.subf %199, %202 : vector<2x8x128xf32>
    %cst_92 = arith.constant 0.000000e+00 : f32
    %204 = vector.broadcast %cst_92 : f32 to vector<2x8x128xf32>
    %205 = arith.maximumf %203, %204 : vector<2x8x128xf32>
    %206 = arith.mulf %196, %205 : vector<2x8x128xf32>
    %207 = arith.subf %186, %184 : vector<2x8x128xf32>
    %208 = arith.subf %187, %185 : vector<2x8x128xf32>
    %209 = arith.mulf %207, %208 : vector<2x8x128xf32>
    %210 = vector.shape_cast %175 : vector<8x128xf32> to vector<1x8x128xf32>
    %211 = vector.broadcast %210 : vector<1x8x128xf32> to vector<2x8x128xf32>
    %212 = arith.addf %209, %211 : vector<2x8x128xf32>
    %213 = arith.subf %212, %206 : vector<2x8x128xf32>
    %214 = vector.extract_strided_slice %206 {offsets = [0, 0, 0], sizes = [1, 8, 128], strides = [1, 1, 1]} : vector<2x8x128xf32> to vector<1x8x128xf32>
    %215 = vector.shape_cast %214 : vector<1x8x128xf32> to vector<8x128xf32>
    %216 = vector.extract_strided_slice %213 {offsets = [0, 0, 0], sizes = [1, 8, 128], strides = [1, 1, 1]} : vector<2x8x128xf32> to vector<1x8x128xf32>
    %217 = vector.shape_cast %216 : vector<1x8x128xf32> to vector<8x128xf32>
    %218 = vector.extract_strided_slice %141 {offsets = [0, 0, 0], sizes = [1, 8, 128], strides = [1, 1, 1]} : vector<2x8x128xf32> to vector<1x8x128xf32>
    %219 = vector.shape_cast %218 : vector<1x8x128xf32> to vector<8x128xf32>
    %220 = vector.extract_strided_slice %142 {offsets = [0, 0, 0], sizes = [1, 8, 128], strides = [1, 1, 1]} : vector<2x8x128xf32> to vector<1x8x128xf32>
    %221 = vector.shape_cast %220 : vector<1x8x128xf32> to vector<8x128xf32>
    %222 = vector.extract_strided_slice %143 {offsets = [0, 0, 0], sizes = [1, 8, 128], strides = [1, 1, 1]} : vector<2x8x128xf32> to vector<1x8x128xf32>
    %223 = vector.shape_cast %222 : vector<1x8x128xf32> to vector<8x128xf32>
    %224 = vector.extract_strided_slice %144 {offsets = [0, 0, 0], sizes = [1, 8, 128], strides = [1, 1, 1]} : vector<2x8x128xf32> to vector<1x8x128xf32>
    %225 = vector.shape_cast %224 : vector<1x8x128xf32> to vector<8x128xf32>
    %226 = vector.extract_strided_slice %145 {offsets = [0, 0, 0], sizes = [1, 8, 128], strides = [1, 1, 1]} : vector<2x8x128xf32> to vector<1x8x128xf32>
    %227 = vector.shape_cast %226 : vector<1x8x128xf32> to vector<8x128xf32>
    %228 = vector.extract_strided_slice %206 {offsets = [1, 0, 0], sizes = [1, 8, 128], strides = [1, 1, 1]} : vector<2x8x128xf32> to vector<1x8x128xf32>
    %229 = vector.shape_cast %228 : vector<1x8x128xf32> to vector<8x128xf32>
    %230 = arith.mulf %229, %217 : vector<8x128xf32>
    %231 = vector.extract_strided_slice %213 {offsets = [1, 0, 0], sizes = [1, 8, 128], strides = [1, 1, 1]} : vector<2x8x128xf32> to vector<1x8x128xf32>
    %232 = vector.shape_cast %231 : vector<1x8x128xf32> to vector<8x128xf32>
    %233 = arith.mulf %215, %232 : vector<8x128xf32>
    %234 = arith.cmpf ogt, %230, %233 : vector<8x128xf32>
    %235 = vector.extract_strided_slice %141 {offsets = [1, 0, 0], sizes = [1, 8, 128], strides = [1, 1, 1]} : vector<2x8x128xf32> to vector<1x8x128xf32>
    %236 = vector.shape_cast %235 : vector<1x8x128xf32> to vector<8x128xf32>
    %237 = arith.select %234, %236, %219 : vector<8x128xi1>, vector<8x128xf32>
    %238 = vector.extract_strided_slice %142 {offsets = [1, 0, 0], sizes = [1, 8, 128], strides = [1, 1, 1]} : vector<2x8x128xf32> to vector<1x8x128xf32>
    %239 = vector.shape_cast %238 : vector<1x8x128xf32> to vector<8x128xf32>
    %240 = arith.select %234, %239, %221 : vector<8x128xi1>, vector<8x128xf32>
    %241 = vector.extract_strided_slice %143 {offsets = [1, 0, 0], sizes = [1, 8, 128], strides = [1, 1, 1]} : vector<2x8x128xf32> to vector<1x8x128xf32>
    %242 = vector.shape_cast %241 : vector<1x8x128xf32> to vector<8x128xf32>
    %243 = arith.select %234, %242, %223 : vector<8x128xi1>, vector<8x128xf32>
    %244 = vector.extract_strided_slice %144 {offsets = [1, 0, 0], sizes = [1, 8, 128], strides = [1, 1, 1]} : vector<2x8x128xf32> to vector<1x8x128xf32>
    %245 = vector.shape_cast %244 : vector<1x8x128xf32> to vector<8x128xf32>
    %246 = arith.select %234, %245, %225 : vector<8x128xi1>, vector<8x128xf32>
    %247 = vector.extract_strided_slice %145 {offsets = [1, 0, 0], sizes = [1, 8, 128], strides = [1, 1, 1]} : vector<2x8x128xf32> to vector<1x8x128xf32>
    %248 = vector.shape_cast %247 : vector<1x8x128xf32> to vector<8x128xf32>
    %249 = arith.select %234, %248, %227 : vector<8x128xi1>, vector<8x128xf32>
    %cst_93 = arith.constant 1.000000e+00 : f32
    %250 = vector.broadcast %cst_93 : f32 to vector<8x128xf32>
    %251 = arith.subf %249, %250 : vector<8x128xf32>
    %c0_94 = arith.constant 0 : index
    %c0_95 = arith.constant 0 : index
    %252 = vector.load %arg6[%c0_94, %c0_95] : memref<8x128xf32, #tpu.memory_space<vmem>>, vector<8x128xf32>
    %253 = arith.mulf %147, %251 : vector<8x128xf32>
    %254 = arith.mulf %253, %251 : vector<8x128xf32>
    %255 = arith.addf %252, %254 : vector<8x128xf32>
    %c0_96 = arith.constant 0 : index
    %c0_97 = arith.constant 0 : index
    %256 = vector.load %arg6[%c0_96, %c0_97] : memref<8x128xf32, #tpu.memory_space<vmem>>, vector<8x128xf32>
    tpu.vector_store %arg6[%c0_96, %c0_97], %255 {strides = array<i32>} : memref<8x128xf32, #tpu.memory_space<vmem>>, vector<8x128xf32>,
    %257 = arith.subf %237, %166 : vector<8x128xf32>
    %258 = arith.mulf %257, %257 : vector<8x128xf32>
    %259 = arith.subf %240, %168 : vector<8x128xf32>
    %260 = arith.mulf %259, %259 : vector<8x128xf32>
    %261 = arith.addf %258, %260 : vector<8x128xf32>
    %262 = math.sqrt %243 : vector<8x128xf32>
    %263 = math.sqrt %170 : vector<8x128xf32>
    %264 = arith.subf %262, %263 : vector<8x128xf32>
    %265 = arith.mulf %264, %264 : vector<8x128xf32>
    %266 = math.sqrt %246 : vector<8x128xf32>
    %267 = math.sqrt %172 : vector<8x128xf32>
    %268 = arith.subf %266, %267 : vector<8x128xf32>
    %269 = arith.mulf %268, %268 : vector<8x128xf32>
    %270 = arith.addf %265, %269 : vector<8x128xf32>
    %c0_98 = arith.constant 0 : index
    %c0_99 = arith.constant 0 : index
    %271 = vector.load %arg7[%c0_98, %c0_99] : memref<8x128xf32, #tpu.memory_space<vmem>>, vector<8x128xf32>
    %cst_100 = arith.constant 0.000000e+00 : f32
    %272 = vector.broadcast %cst_100 : f32 to vector<8x128xf32>
    %273 = arith.cmpf ogt, %147, %272 : vector<8x128xf32>
    %274 = arith.addf %261, %270 : vector<8x128xf32>
    %cst_101 = arith.constant 0.000000e+00 : f32
    %275 = vector.broadcast %cst_101 : f32 to vector<8x128xf32>
    %276 = arith.select %273, %274, %275 : vector<8x128xi1>, vector<8x128xf32>
    %277 = arith.addf %271, %276 : vector<8x128xf32>
    %c0_102 = arith.constant 0 : index
    %c0_103 = arith.constant 0 : index
    %278 = vector.load %arg7[%c0_102, %c0_103] : memref<8x128xf32, #tpu.memory_space<vmem>>, vector<8x128xf32>
    tpu.vector_store %arg7[%c0_102, %c0_103], %277 {strides = array<i32>} : memref<8x128xf32, #tpu.memory_space<vmem>>, vector<8x128xf32>,
    %c1_i32 = arith.constant 1 : i32
    %279 = arith.cmpi eq, %arg1, %c1_i32 : i32
    %280 = arith.extui %279 : i1 to i32
    %c0_i32_104 = arith.constant 0 : i32
    %281 = arith.cmpi ne, %280, %c0_i32_104 : i32
    scf.if %281 {
      %282 = tpu.iota {dimensions = array<i32: 1>} : vector<1x128xi32>
      %c0_i32_105 = arith.constant 0 : i32
      %283 = vector.broadcast %c0_i32_105 : i32 to vector<1x128xi32>
      %284 = arith.cmpi eq, %282, %283 : vector<1x128xi32>
      %c0_106 = arith.constant 0 : index
      %c0_107 = arith.constant 0 : index
      %285 = vector.load %arg4[%c0_106, %c0_107] : memref<8x128xf32, #tpu.memory_space<vmem>>, vector<8x128xf32>
      %286 = vector.shape_cast %285 : vector<8x128xf32> to vector<1x8x128xf32>
      %cst_108 = arith.constant dense<0.000000e+00> : vector<1xf32>
      %287 = vector.multi_reduction <add>, %286, %cst_108 [1, 2] : vector<1x8x128xf32> to vector<1xf32>
      %288 = vector.shape_cast %287 : vector<1xf32> to vector<1x1x1xf32>
      %289 = vector.extract %288[0, 0, 0] : f32 from vector<1x1x1xf32>
      %cst_109 = arith.constant 0.000000e+00 : f32
      %290 = vector.broadcast %289 : f32 to vector<1x128xf32>
      %291 = vector.broadcast %cst_109 : f32 to vector<1x128xf32>
      %292 = arith.select %284, %290, %291 : vector<1x128xi1>, vector<1x128xf32>
      %c1_i32_110 = arith.constant 1 : i32
      %293 = vector.broadcast %c1_i32_110 : i32 to vector<1x128xi32>
      %294 = arith.cmpi eq, %282, %293 : vector<1x128xi32>
      %c0_111 = arith.constant 0 : index
      %c0_112 = arith.constant 0 : index
      %295 = vector.load %arg5[%c0_111, %c0_112] : memref<8x128xf32, #tpu.memory_space<vmem>>, vector<8x128xf32>
      %296 = vector.shape_cast %295 : vector<8x128xf32> to vector<1x8x128xf32>
      %cst_113 = arith.constant dense<0.000000e+00> : vector<1xf32>
      %297 = vector.multi_reduction <add>, %296, %cst_113 [1, 2] : vector<1x8x128xf32> to vector<1xf32>
      %298 = vector.shape_cast %297 : vector<1xf32> to vector<1x1x1xf32>
      %299 = vector.extract %298[0, 0, 0] : f32 from vector<1x1x1xf32>
      %cst_114 = arith.constant 0.000000e+00 : f32
      %300 = vector.broadcast %299 : f32 to vector<1x128xf32>
      %301 = vector.broadcast %cst_114 : f32 to vector<1x128xf32>
      %302 = arith.select %294, %300, %301 : vector<1x128xi1>, vector<1x128xf32>
      %303 = arith.addf %292, %302 : vector<1x128xf32>
      %c2_i32 = arith.constant 2 : i32
      %304 = vector.broadcast %c2_i32 : i32 to vector<1x128xi32>
      %305 = arith.cmpi eq, %282, %304 : vector<1x128xi32>
      %c0_115 = arith.constant 0 : index
      %c0_116 = arith.constant 0 : index
      %306 = vector.load %arg6[%c0_115, %c0_116] : memref<8x128xf32, #tpu.memory_space<vmem>>, vector<8x128xf32>
      %307 = vector.shape_cast %306 : vector<8x128xf32> to vector<1x8x128xf32>
      %cst_117 = arith.constant dense<0.000000e+00> : vector<1xf32>
      %308 = vector.multi_reduction <add>, %307, %cst_117 [1, 2] : vector<1x8x128xf32> to vector<1xf32>
      %309 = vector.shape_cast %308 : vector<1xf32> to vector<1x1x1xf32>
      %310 = vector.extract %309[0, 0, 0] : f32 from vector<1x1x1xf32>
      %cst_118 = arith.constant 0.000000e+00 : f32
      %311 = vector.broadcast %310 : f32 to vector<1x128xf32>
      %312 = vector.broadcast %cst_118 : f32 to vector<1x128xf32>
      %313 = arith.select %305, %311, %312 : vector<1x128xi1>, vector<1x128xf32>
      %314 = arith.addf %303, %313 : vector<1x128xf32>
      %c3_i32 = arith.constant 3 : i32
      %315 = vector.broadcast %c3_i32 : i32 to vector<1x128xi32>
      %316 = arith.cmpi eq, %282, %315 : vector<1x128xi32>
      %c0_119 = arith.constant 0 : index
      %c0_120 = arith.constant 0 : index
      %317 = vector.load %arg7[%c0_119, %c0_120] : memref<8x128xf32, #tpu.memory_space<vmem>>, vector<8x128xf32>
      %318 = vector.shape_cast %317 : vector<8x128xf32> to vector<1x8x128xf32>
      %cst_121 = arith.constant dense<0.000000e+00> : vector<1xf32>
      %319 = vector.multi_reduction <add>, %318, %cst_121 [1, 2] : vector<1x8x128xf32> to vector<1xf32>
      %320 = vector.shape_cast %319 : vector<1xf32> to vector<1x1x1xf32>
      %321 = vector.extract %320[0, 0, 0] : f32 from vector<1x1x1xf32>
      %cst_122 = arith.constant 0.000000e+00 : f32
      %322 = vector.broadcast %321 : f32 to vector<1x128xf32>
      %323 = vector.broadcast %cst_122 : f32 to vector<1x128xf32>
      %324 = arith.select %316, %322, %323 : vector<1x128xi1>, vector<1x128xf32>
      %325 = arith.addf %314, %324 : vector<1x128xf32>
      %c0_123 = arith.constant 0 : index
      %c0_124 = arith.constant 0 : index
      %c0_125 = arith.constant 0 : index
      %326 = vector.load %arg3[%c0_123, %c0_124, %c0_125] : memref<1x1x128xf32, #tpu.memory_space<vmem>>, vector<1x1x128xf32>
      %327 = vector.shape_cast %326 : vector<1x1x128xf32> to vector<1x128xf32>
      %328 = vector.shape_cast %325 : vector<1x128xf32> to vector<1x1x128xf32>
      tpu.vector_store %arg3[%c0_123, %c0_124, %c0_125], %328 {strides = array<i32>} : memref<1x1x128xf32, #tpu.memory_space<vmem>>, vector<1x1x128xf32>,
    } else {
    }
    return
  }
  func.func @transform_0(%arg0: i32, %arg1: i32) -> (i32, i32, i32) {
    %c2_i32 = arith.constant 2 : i32
    %0 = arith.muli %arg0, %c2_i32 : i32
    %1 = arith.addi %0, %arg1 : i32
    %c0_i32 = arith.constant 0 : i32
    %c0_i32_0 = arith.constant 0 : i32
    %c0_i32_1 = arith.constant 0 : i32
    return %c0_i32, %1, %c0_i32_0 : i32, i32, i32
  }
  func.func @transform_1(%arg0: i32, %arg1: i32) -> (i32, i32, i32) {
    %c0_i32 = arith.constant 0 : i32
    %c0_i32_0 = arith.constant 0 : i32
    %c0_i32_1 = arith.constant 0 : i32
    return %arg0, %c0_i32, %c0_i32_0 : i32, i32, i32
  }
}

</mosaic_0001>

<bundles_post_ra>
// kernel: tpu_custom_call.1
= control target key start
LH: loop header
LB: loop body
LE: loop exit
PB: predicated region body
PF: predicated region fallthrough
CT: control target
= control target key end

     0   :  { %6 = vsyncpa [#allocation7], 0  ;;  %s1859_s0 = inlined_call_operand.hbm [shape: f32[57,64,128], index: 0, kind: input, shape index: {}]   ;;  %s1860_s1 = inlined_call_operand.hbm [shape: f32[2,1,128], index: 1, kind: output, shape index: {}]  }
   0x1   :  { %8 = vsyncpa [#allocation7 + $0x1], 0 }
   0x2   :  { %9 = vsyncpa [#allocation8], 0 }
   0x3   :  { %11 = vsyncpa [#allocation8 + $0x1], 0  ;;  %s1224_s6 = smov 0   ;;  %s1226_s7 = smov 0  }
   0x4   :  { %s1228_s8 = smov 0   ;;  %s1230_s9 = smov 0  }
   0x5   :  { %s1232_s10 = smov 0   ;;  %s1234_s11 = smov 0  }
   0x6   :  { %s1236_s12 = smov 0   ;;  %s1238_s13 = smov 0  }
   0x7   :  { %s1240_s14 = smov 0   ;;  %s1242_s15 = smov 0  }
   0x8   :  { %s1244_s16 = smov 0  }
   0x9 LB: > { %1875 = sst [smem:[#allocation15_spill]] %s1200_s15  ;;  %s817_s17 = sadd.s32 4294967295, %s1204_s16   ;;  %s1204_s16 = sphi %s1244_s16, %s17_s16   ;;  %s1200_s15 = sphi %s1242_s15, %s1915_s15   ;;  %s1196_s14 = sphi %s1240_s14, %s1923_s14   ;;  %s1192_s13 = sphi %s1238_s13, %s1913_s13   ;;  %s1188_s12 = sphi %s1236_s12, %s1922_s12   ;;  %s1184_s11 = sphi %s1234_s11, %s1921_s11   ;;  %s1180_s10 = sphi %s1232_s10, %s1920_s10   ;;  %s1176_s9 = sphi %s1230_s9, %s1919_s9   ;;  %s1172_s8 = sphi %s1228_s8, %s1918_s8   ;;  %s1168_s7 = sphi %s1226_s7, %s1917_s7   ;;  %s1164_s6 = sphi %s1224_s6, %s1916_s6  }
   0xa   : > { %s818_s18 = sadd.s32 4294967294, %s1204_s16   ;;  %s26_s19 = sadd.s32 1, %s1196_s14 }
   0xb   : > { %s29_s20 = sadd.s32 1, %s1200_s15  ;;  %p27_p0 = scmp.ge.s32.totalorder %s26_s19, 2 }
   0xc   : > { %s819_s21 = sshll.u32 %s1200_s15, 1  ;;  %s40_s23 = sadd.s32 1, %s1184_s11 }
   0xd   : > { %s1283_s22 = sadd.s32 %s1196_s14, %s819_s21  ;;  %s1925_s19 = smov (%p27_p0, %s26_s19), 0 }
   0xe   : > { %1876 = sst [smem:[#allocation16_spill]] %s1925_s19  ;;  %s1927_s20 = smov (!%p27_p0, %s29_s20), %s1200_s15 }
   0xf   : > { %p47_p1 = scmp.ne.s32.totalorder %s1184_s11, %s1180_s10  ;;  %p48_p2 = scmp.eq.s32.totalorder %s1204_s16, 0 }
  0x10   : > { %p31_p3 = scmp.ge.s32.totalorder %s1927_s20, 2  ;;  %p53_p4 = scmp.ne.s32.totalorder %s1180_s10, %s1176_s9 }
  0x11   : > { %p1293_p5 = por %p48_p2, %p47_p1  ;;  %p54_p6 = scmp.eq.s32.totalorder %s817_s17, 0 }
  0x12   : > { %s1929_s20 = smov (%p31_p3, %s1927_s20), 0  ;;  %s66_s26 = sadd.s32 1, %s1172_s8 }
  0x13   : > { %1878 = sst [smem:[#allocation17_spill]] %s1929_s20  ;;  %p1299_p7 = por %p54_p6, %p53_p4 }
  0x14   : > { %s820_s27 = sshll.u32 %s1929_s20, 1  ;;  %s63_s28 = ssub.s32 %s1200_s15, %s1929_s20 }
  0x15   : > { %s36_s29 = sadd.s32 %s820_s27, %s1925_s19  ;;  %p64_p8 = scmp.eq.s32.totalorder %s63_s28, 0 }
  0x16   : > { %s37_s30 = ssub.s32 %s1283_s22, %s36_s29  ;;  %p76_p9 = scmp.ne.s32.totalorder %s1172_s8, %s1168_s7 }
  0x17   : > { %p38_p10 = scmp.eq.s32.totalorder %s37_s30, 0  ;;  %p77_p11 = scmp.eq.s32.totalorder %s817_s17, 3 }
  0x18   : > { %s1312_s2 = scalar_select %p64_p8, %s1172_s8, %s66_s26  }
  0x19   : > { %s1315_s3 = scalar_select %p38_p10, %s1184_s11, %s40_s23  }
  0x1a   : > { %p1317_p12 = por %p77_p11, %p76_p9  ;;  %p82_p13 = scmp.ne.s32.totalorder %s1168_s7, %s1164_s6 }
  0x1b   : > { %p83_p0 = scmp.eq.s32.totalorder %s818_s18, 3  ;;  %p822_p2 = scmp.ge.s32.totalorder %s1204_s16, 4 }
  0x1d   : > { %p1325_p1 = por %p83_p0, %p82_p13  ;;  %99 = sbr.rel (%p822_p2) target bundleno = 48 (0x30), region = 16 }
  0x22   : > { %s103_s9 = sand.u32 1, %s1184_s11   ;;  %s946_s21 = sshll.u32 %s1283_s22, 8 }
  0x23   : > { %s947_s17 = smul.u32 912, %s103_s9  ;;  %s1206_s23 = smov 1024  }
  0x24   : > { %958 = sst [smem:[#allocation11]] (%p1293_p5), %s1206_s23  ;;  %s115_s28 = scalar_lea.hbm %s1859_s0, %s946_s21 }
  0x25   : > { %s957_s18 = scalar_select %p1293_p5, [#allocation0], [#allocation12] }
  0x26   : > { %s107_s30 = scalar_lea.vmem [#allocation6], %s947_s17  ;;  %s1207_s19 = smov 256  }
  0x27   : > { %s120_s29 = sld [smem:[%s957_s18]]   ;;  %s128_s20 = sshll.u32 %s107_s30, 4  ;;  %s129_s20 = int_to_ptr.vmem [resolvable:$true] %s128_s20 }
  0x28   : > { %959 = sst [smem:[#allocation11 + $0x1]] (%p1293_p5), %s1207_s19  ;;  %s1208_s15 = smov 2  }
  0x29   : > { %960 = sst [smem:[#allocation11 + $0x2]] (%p1293_p5), %s1208_s15  ;;  %s1209_s22 = smov 128  }
  0x2a   : > { %961 = sst [smem:[#allocation11 + $0x3]] (%p1293_p5), %s1209_s22  ;;  %s1210_s23 = smov 8  }
  0x2b   : > { %962 = sst [smem:[#allocation11 + $0x4]] (%p1293_p5), %s1209_s22  ;;  %s104_s17 = scalar_lea.sflag [#allocation7], %s103_s9 }
  0x2c   : > { %963 = sst [smem:[#allocation11 + $0x5]] (%p1293_p5), %s1210_s23  ;;  %s1211_s26 = smov 131072  }
  0x2d   : > { %s826_s21 = sshll.u32 %s120_s29, 26 }
  0x2e   : > { %s827_s18 = sadd.s32 134217728, %s826_s21 }
  0x2f   : > { %964 = dma.general (%p1293_p5), %s115_s28, 14592, %s129_s20, %s104_s17, %s1211_s26, [#allocation11], %s827_s18, 0  }
  0x30 PF: > { %p828_p3 = scmp.ge.s32.totalorder %s1204_s16, 1  ;;  %p149_p4 = scmp.lt.s32.totalorder %s1204_s16, 5 }
  0x32   : > { %p150_p6 = pnand %p828_p3, %p149_p4 }
  0x34   : > { %153 = sbr.rel (%p150_p6) target bundleno = 416 (0x1a0), region = 24 }
  0x39   : > { %s155_s15 = sand.u32 1, %s1180_s10  }
  0x3a   : > { %s948_s19 = smul.u32 912, %s155_s15  ;;  %s156_s27 = scalar_lea.sflag [#allocation7], %s155_s15 }
  0x3c   : > { %s1354_s30 = scalar_lea.vmem [#allocation6], %s948_s19 }
  0x3d   : > { %1155 = dma.done.wait (%p1299_p7), %s156_s27, 14592  }
  0x3e   : > { %1157 = vsyncadd (%p1299_p7), %s156_s27, 4294952704  ;;  %s175_s20 = sand.u32 1, %s1168_s7   ;;  %p829_p5 = scmp.ne.s32.totalorder %s1188_s12, 0 }
  0x3f   : > { %s1363_s24 = scalar_lea.vmem [#allocation9], %s175_s20 }
  0x40   : > { %183 = sbr.rel (%p829_p5) target bundleno = 72 (0x48), region = 32 }
  0x45   : > { %v1212_v0 = vmov 0.0  }
  0x46   : > { %184 = vst [vmem:[#allocation2] sm:$0xff] %v1212_v0  ;;  %185 = vst [vmem:[#allocation3] sm:$0xff] %v1212_v0 }
  0x47   : > { %186 = vst [vmem:[#allocation4] sm:$0xff] %v1212_v0  ;;  %187 = vst [vmem:[#allocation5] sm:$0xff] %v1212_v0 }
  0x48 PF: > { %v841_v1 = vld [vmem:[%s1354_s30 + $0xa0] sm:$0xff]  ;;  %v842_v2 = vld [vmem:[%s1354_s30 + $0xb0] sm:$0xff]  ;;  %p942_p7 = scmp.ne.s32.totalorder %s1188_s12, 1 }
  0x49   : > { %v861_v3 = vld [vmem:[%s1354_s30 + $0x220] sm:$0xff]  ;;  %v862_v4 = vld [vmem:[%s1354_s30 + $0x230] sm:$0xff] }
  0x4a   : > { %v843_v5 = vld [vmem:[%s1354_s30 + $0xc0] sm:$0xff]  ;;  %v844_v7 = vld [vmem:[%s1354_s30 + $0xd0] sm:$0xff]  ;;  %v249_v10 = vsub.f32 %v841_v1, %v861_v3  ;;  %v250_v11 = vsub.f32 %v842_v2, %v862_v4 }
  0x4b   : > { %v863_v6 = vld [vmem:[%s1354_s30 + $0x240] sm:$0xff]  ;;  %v846_v9 = vld [vmem:[%s1354_s30 + $0xf0] sm:$0xff] }
  0x4c   : > { %v845_v8 = vld [vmem:[%s1354_s30 + $0xe0] sm:$0xff]  ;;  %v848_v13 = vld [vmem:[%s1354_s30 + $0x110] sm:$0xff]  ;;  %v251_v18 = vsub.f32 %v843_v5, %v863_v6  ;;  %v270_v26 = vmul.f32 %v249_v10, %v249_v10  ;;  %v271_v27 = vmul.f32 %v250_v11, %v250_v11 }
  0x4d   : > { %v847_v12 = vld [vmem:[%s1354_s30 + $0x100] sm:$0xff]  ;;  %v864_v14 = vld [vmem:[%s1354_s30 + $0x250] sm:$0xff] }
  0x4e   : > { %v865_v15 = vld [vmem:[%s1354_s30 + $0x260] sm:$0xff]  ;;  %v866_v16 = vld [vmem:[%s1354_s30 + $0x270] sm:$0xff]  ;;  %v252_v25 = vsub.f32 %v844_v7, %v864_v14  ;;  %v272_v35 = vmul.f32 %v251_v18, %v251_v18  ;;  %v290_v44 = vadd.f32 %v271_v27, %v270_v26 }
  0x4f   : > { %v867_v17 = vld [vmem:[%s1354_s30 + $0x280] sm:$0xff]  ;;  %v850_v20 = vld [vmem:[%s1354_s30 + $0x130] sm:$0xff]  ;;  %v253_v31 = vsub.f32 %v845_v8, %v865_v15  ;;  %v254_v32 = vsub.f32 %v846_v9, %v866_v16 }
  0x50   : > { %v849_v19 = vld [vmem:[%s1354_s30 + $0x120] sm:$0xff]  ;;  %v868_v21 = vld [vmem:[%s1354_s30 + $0x290] sm:$0xff]  ;;  %v255_v33 = vsub.f32 %v847_v12, %v867_v17  ;;  %v273_v43 = vmul.f32 %v252_v25, %v252_v25  ;;  %v291_v56 = vadd.f32 %v290_v44, %v272_v35 }
  0x51   : > { %v851_v22 = vld [vmem:[%s1354_s30 + $0x140] sm:$0xff]  ;;  %v870_v24 = vld [vmem:[%s1354_s30 + $0x2b0] sm:$0xff]  ;;  %v256_v34 = vsub.f32 %v848_v13, %v868_v21  ;;  %v274_v48 = vmul.f32 %v253_v31, %v253_v31  ;;  %v275_v49 = vmul.f32 %v254_v32, %v254_v32 }
  0x52   : > { %v869_v23 = vld [vmem:[%s1354_s30 + $0x2a0] sm:$0xff]  ;;  %v852_v28 = vld [vmem:[%s1354_s30 + $0x150] sm:$0xff]  ;;  %v258_v38 = vsub.f32 %v850_v20, %v870_v24  ;;  %v276_v50 = vmul.f32 %v255_v33, %v255_v33  ;;  %v292_v3 = vadd.f32 %v291_v56, %v273_v43 }
  0x53   : > { %v871_v29 = vld [vmem:[%s1354_s30 + $0x2c0] sm:$0xff]  ;;  %v872_v30 = vld [vmem:[%s1354_s30 + $0x2d0] sm:$0xff]  ;;  %v257_v37 = vsub.f32 %v849_v19, %v869_v23  ;;  %v277_v55 = vmul.f32 %v256_v34, %v256_v34 }
  0x54   : > { %v1391_v36 = vld [vmem:[%s1354_s30] sm:$0xff]  ;;  %v1394_v39 = vld [vmem:[%s1354_s30 + $0x10] sm:$0xff]  ;;  %v1399_v41 = vsub.f32 %v851_v22, %v871_v29  ;;  %v1401_v42 = vsub.f32 %v852_v28, %v872_v30  ;;  %v279_v6 = vmul.f32 %v258_v38, %v258_v38  ;;  %v293_v10 = vadd.f32 %v292_v3, %v274_v48 }
  0x55   : > { %1882 = vst [vmem:[#allocation18_spill] sm:$0xff] %v1391_v36  ;;  %v1397_v40 = vld [vmem:[%s1354_s30 + $0x20] sm:$0xff]  ;;  %v1404_v45 = vld [vmem:[%s1354_s30 + $0x30] sm:$0xff]  ;;  %v328_v54 = vmul.f32 0.071428575, %v1391_v36  ;;  %v278_v2 = vmul.f32 %v257_v37, %v257_v37 }
  0x56   : > { %1883 = vst [vmem:[#allocation19_spill] sm:$0xff] %v1397_v40  ;;  %1884 = vst [vmem:[#allocation20_spill] sm:$0xff] %v1404_v45  ;;  %v1407_v46 = vld [vmem:[%s1354_s30 + $0x40] sm:$0xff]  ;;  %v1410_v47 = vld [vmem:[%s1354_s30 + $0x50] sm:$0xff]  ;;  %v329_v61 = vmul.f32 0.071428575, %v1394_v39  ;;  %v294_v18 = vadd.f32 %v293_v10, %v275_v49 }
  0x57   : > { %v1413_v51 = vld [vmem:[%s1354_s30 + $0x60] sm:$0xff]  ;;  %v1423_v57 = vld [vmem:[%s1354_s30 + $0x70] sm:$0xff]  ;;  %v330_v63 = vmul.f32 0.071428575, %v1397_v40  ;;  %v331_v0 = vmul.f32 0.071428575, %v1404_v45 }
  0x58   : > { %v1416_v52 = vld [vmem:[%s1354_s30 + $0x1e0] sm:$0xff]  ;;  %v1426_v58 = vld [vmem:[%s1354_s30 + $0x1f0] sm:$0xff]  ;;  %v332_v1 = vmul.f32 0.5, %v1407_v46  ;;  %v333_v4 = vmul.f32 0.5, %v1410_v47  ;;  %v334_v5 = vmul.f32 0.5, %v1413_v51  ;;  %v335_v7 = vmul.f32 0.5, %v1423_v57 }
  0x59   : > { %v1419_v53 = vld [vmem:[%s1354_s30 + $0x200] sm:$0xff]  ;;  %1885 = vst [vmem:[#allocation21_spill] sm:$0xff] %v1426_v58  ;;  %v1429_v59 = vld [vmem:[%s1354_s30 + $0x210] sm:$0xff]  ;;  %v295_v26 = vadd.f32 %v294_v18, %v276_v50 }
  0x5a   : > { %v325_v60 = vsub.f32 %v1419_v53, %v1416_v52  ;;  %v326_v62 = vsub.f32 %v1429_v59, %v1426_v58  ;;  %v336_v8 = vsub.f32 %v328_v54, %v332_v1  ;;  %v340_v9 = vadd.f32 %v332_v1, %v328_v54  ;;  %v853_v34 = vld [vmem:[%s1354_s30 + $0x160] sm:$0xff] }
  0x5b   : > { %v337_v11 = vsub.f32 %v329_v61, %v333_v4  ;;  %v338_v12 = vsub.f32 %v330_v63, %v334_v5  ;;  %v341_v13 = vadd.f32 %v333_v4, %v329_v61  ;;  %v339_v15 = vsub.f32 %v331_v0, %v335_v7  ;;  %v873_v35 = vld [vmem:[%s1354_s30 + $0x2e0] sm:$0xff]  ;;  %v1460_v4 = vld [vmem:[%s1354_s30 + $0x90] sm:$0xff] }
  0x5c   : > { %v327_v14 = vmul.f32 %v326_v62, %v325_v60  ;;  %v342_v16 = vadd.f32 %v334_v5, %v330_v63  ;;  %v343_v17 = vadd.f32 %v335_v7, %v331_v0  ;;  %v344_v19 = vmin.f32 %v340_v9, %v1419_v53  ;;  %v1455_v63 = vld [vmem:[%s1354_s30 + $0x80] sm:$0xff]  ;;  %v839_v5 = vld [vmem:[%s1354_s30 + $0x370] sm:$0xff] }
  0x5d   : > { %v345_v20 = vmin.f32 %v341_v13, %v1419_v53  ;;  %v346_v21 = vmax.f32 %v336_v8, %v1416_v52  ;;  %v347_v22 = vmax.f32 %v337_v11, %v1416_v52  ;;  %v354_v25 = vmax.f32 %v338_v12, %v1426_v58 }
  0x5e   : > { %v352_v23 = vmin.f32 %v342_v16, %v1429_v59  ;;  %v353_v24 = vmin.f32 %v343_v17, %v1429_v59  ;;  %v355_v28 = vmax.f32 %v339_v15, %v1426_v58  ;;  %v362_v29 = vsub.f32 %v340_v9, %v336_v8  ;;  %v854_v8 = vld [vmem:[%s1354_s30 + $0x170] sm:$0xff] }
  0x5f   : > { %v348_v27 = vsub.f32 %v344_v19, %v346_v21  ;;  %v349_v30 = vsub.f32 %v345_v20, %v347_v22  ;;  %v363_v32 = vsub.f32 %v341_v13, %v337_v11  ;;  %v364_v33 = vsub.f32 %v342_v16, %v338_v12  ;;  %v874_v9 = vld [vmem:[%s1354_s30 + $0x2f0] sm:$0xff]  ;;  %v855_v13 = vld [vmem:[%s1354_s30 + $0x180] sm:$0xff] }
  0x60   : > { %v356_v31 = vsub.f32 %v352_v23, %v354_v25  ;;  %v296_v37 = vadd.f32 %v295_v26, %v277_v55  ;;  %v357_v43 = vsub.f32 %v353_v24, %v355_v28  ;;  %v365_v44 = vsub.f32 %v343_v17, %v339_v15  ;;  %v856_v15 = vld [vmem:[%s1354_s30 + $0x190] sm:$0xff]  ;;  %v859_v20 = vld [vmem:[%s1354_s30 + $0x1c0] sm:$0xff] }
  0x61   : > { %v350_v38 = vmax.f32 %v348_v27, 0.0  ;;  %v351_v48 = vmax.f32 %v349_v30, 0.0  ;;  %v366_v50 = vmul.f32 %v364_v33, %v362_v29  ;;  %v280_v54 = vmul.f32 %v1399_v41, %v1399_v41  ;;  %v840_v41 = vld [vmem:[%s1354_s30 + $0x380] sm:$0xff]  ;;  %v858_v19 = vld [vmem:[%s1354_s30 + $0x1b0] sm:$0xff] }
  0x62   : > { %v358_v49 = vmax.f32 %v356_v31, 0.0  ;;  %v297_v56 = vadd.f32 %v296_v37, %v278_v2  ;;  %v359_v60 = vmax.f32 %v357_v43, 0.0  ;;  %v367_v61 = vmul.f32 %v365_v44, %v363_v32  ;;  %v875_v21 = vld [vmem:[%s1354_s30 + $0x300] sm:$0xff]  ;;  %v860_v22 = vld [vmem:[%s1354_s30 + $0x1d0] sm:$0xff] }
  0x63   : > { %v261_v62 = vsub.f32 %v853_v34, %v873_v35  ;;  %v368_v0 = vadd.f32 %v366_v50, %v327_v14  ;;  %v281_v1 = vmul.f32 %v1401_v42, %v1401_v42  ;;  %v313_v42 = vmul.f32 %v839_v5, %v1455_v63  ;;  %v876_v23 = vld [vmem:[%s1354_s30 + $0x310] sm:$0xff]  ;;  %v877_v24 = vld [vmem:[%s1354_s30 + $0x320] sm:$0xff]  ;;  %v903_v5 = vld [vmem:[%s1354_s30 + $0x108] sm:$0xff] }
  0x64   : > { %v360_v55 = vmul.f32 %v358_v49, %v350_v38  ;;  %v298_v3 = vadd.f32 %v297_v56, %v279_v6  ;;  %v361_v7 = vmul.f32 %v359_v60, %v351_v48  ;;  %v369_v2 = vadd.f32 %v367_v61, %v327_v14  ;;  %v857_v14 = vld [vmem:[%s1354_s30 + $0x1a0] sm:$0xff]  ;;  %v878_v27 = vld [vmem:[%s1354_s30 + $0x330] sm:$0xff]  ;;  %v312_v48 = vld [vmem:[#allocation3] sm:$0xff] }
  0x65   : > { %v314_v6 = vmul.f32 %v840_v41, %v1460_v4  ;;  %v262_v16 = vsub.f32 %v854_v8, %v874_v9  ;;  %v282_v17 = vmul.f32 %v261_v62, %v261_v62  ;;  %1068 = vrsqrt.f32 %v1419_v53  ;;  %v879_v28 = vld [vmem:[%s1354_s30 + $0x340] sm:$0xff]  ;;  %v880_v29 = vld [vmem:[%s1354_s30 + $0x350] sm:$0xff]  ;;  %v897_v56 = vld [vmem:[%s1354_s30 + $0xa8] sm:$0xff] }
  0x66   : > { %v299_v10 = vadd.f32 %v298_v3, %v280_v54  ;;  %v370_v11 = vsub.f32 %v368_v0, %v360_v55  ;;  %v371_v12 = vsub.f32 %v369_v2, %v361_v7  ;;  %v315_v30 = vmul.f32 %v1455_v63, %v313_v42  ;;  %v898_v60 = vld [vmem:[%s1354_s30 + $0xb8] sm:$0xff]  ;;  %v899_v61 = vld [vmem:[%s1354_s30 + $0xc8] sm:$0xff]  ;;  %v1502_v2 = vld [vmem:[%s1354_s30 + $0x360] sm:$0xff] }
  0x67   : > { %v316_v31 = vmul.f32 %v1460_v4, %v314_v6  ;;  %v263_v32 = vsub.f32 %v855_v13, %v875_v21  ;;  %v283_v33 = vmul.f32 %v262_v16, %v262_v16  ;;  %v264_v35 = vsub.f32 %v856_v15, %v876_v23  ;;  %v900_v0 = vld [vmem:[%s1354_s30 + $0xd8] sm:$0xff]  ;;  %v917_v41 = vld [vmem:[%s1354_s30 + $0x228] sm:$0xff]  ;;  %1888 = vst [vmem:[#allocation22_spill] sm:$0xff] %v1502_v2 }
  0x68   : > { %v300_v18 = vadd.f32 %v299_v10, %v281_v1  ;;  %v372_v25 = vmul.f32 %v370_v11, %v361_v7  ;;  %v373_v26 = vmul.f32 %v371_v12, %v360_v55  ;;  %v265_v37 = vsub.f32 %v857_v14, %v877_v24  ;;  %v901_v1 = vld [vmem:[%s1354_s30 + $0xe8] sm:$0xff]  ;;  %v902_v3 = vld [vmem:[%s1354_s30 + $0xf8] sm:$0xff] }
  0x69   : > { %1070 = vrsqrt.f32 %v1429_v59  ;;  %v266_v38 = vsub.f32 %v858_v19, %v878_v27  ;;  %v267_v43 = vsub.f32 %v859_v20, %v879_v28  ;;  %v268_v44 = vsub.f32 %v860_v22, %v880_v29  ;;  %v918_v7 = vld [vmem:[%s1354_s30 + $0x238] sm:$0xff]  ;;  %v919_v9 = vld [vmem:[%s1354_s30 + $0x248] sm:$0xff] }
  0x6a   : > { %v301_v34 = vadd.f32 %v300_v18, %v282_v17  ;;  %vm1484_vm0 = vcmp.gt.f32.partialorder %v372_v25, %v373_v26  ;;  %v317_v50 = vadd.f32 %v316_v31, %v315_v30  ;;  %v284_v62 = vmul.f32 %v263_v32, %v263_v32  ;;  %v904_v8 = vld [vmem:[%s1354_s30 + $0x118] sm:$0xff]  ;;  %v921_v13 = vld [vmem:[%s1354_s30 + $0x268] sm:$0xff] }
  0x6b   : > { %v379_v54 = vsel %vm1484_vm0, %v1460_v4, %v1455_v63  ;;  %v285_v63 = vmul.f32 %v264_v35, %v264_v35  ;;  %v1504_v4 = vmul.f32 %v265_v37, %v265_v37  ;;  %v920_v10 = vld [vmem:[%s1354_s30 + $0x258] sm:$0xff]  ;;  %v1509_v11 = vmul.f32 %v266_v38, %v266_v38  ;;  %v923_v14 = vld [vmem:[%s1354_s30 + $0x288] sm:$0xff] }
  0x6c   : > { %v302_v55 = vadd.f32 %v301_v34, %v283_v33  ;;  %v1511_v12 = vmul.f32 %v267_v43, %v267_v43  ;;  %v1513_v42 = vmul.f32 %v268_v44, %v268_v44  ;;  %v885_v6 = vadd.f32 -1.0, %v379_v54  ;;  %v922_v15 = vld [vmem:[%s1354_s30 + $0x278] sm:$0xff]  ;;  %v905_v17 = vld [vmem:[%s1354_s30 + $0x128] sm:$0xff] }
  0x6d   : > { %v1518_v16 = vadd.f32 %v317_v50, %v312_v48  ;;  %vm400_vm1 = vcmp.eq.f32.partialorder %v1419_v53, inf  ;;  %v924_v18 = vld [vmem:[%s1354_s30 + $0x298] sm:$0xff]  ;;  %v925_v19 = vld [vmem:[%s1354_s30 + $0x2a8] sm:$0xff]  ;;  %v483_v20 = vsub.f32 %v897_v56, %v917_v41  ;;  %v484_v21 = vsub.f32 %v898_v60, %v918_v7 }
  0x6e   : > { %v303_v22 = vadd.f32 %v302_v55, %v284_v62  ;;  %v906_v25 = vld [vmem:[%s1354_s30 + $0x138] sm:$0xff]  ;;  %v907_v26 = vld [vmem:[%s1354_s30 + $0x148] sm:$0xff]  ;;  %v485_v28 = vsub.f32 %v899_v61, %v919_v9  ;;  %v486_v33 = vsub.f32 %v900_v0, %v920_v10  ;;  %v487_v34 = vsub.f32 %v901_v1, %v921_v13 }
  0x6f   : > { %v926_v27 = vld [vmem:[%s1354_s30 + $0x2b8] sm:$0xff]  ;;  %v927_v31 = vld [vmem:[%s1354_s30 + $0x2c8] sm:$0xff]  ;;  %v488_v35 = vsub.f32 %v902_v3, %v922_v15  ;;  %v489_v37 = vsub.f32 %v903_v5, %v923_v14  ;;  %v1536_v38 = vsel %vm1484_vm0, %v1410_v47, %v1407_v46  ;;  %v382_v43 = vmul.f32 %v885_v6, %v1502_v2 }
  0x70   : > { %v908_v30 = vld [vmem:[%s1354_s30 + $0x158] sm:$0xff]  ;;  %v909_v44 = vld [vmem:[%s1354_s30 + $0x168] sm:$0xff]  ;;  %v490_v50 = vsub.f32 %v904_v8, %v924_v18  ;;  %v491_v54 = vsub.f32 %v905_v17, %v925_v19  ;;  %v1545_v56 = vsel %vm1484_vm0, %v1423_v57, %v1413_v51  ;;  %v492_v46 = vsub.f32 %v906_v25, %v926_v27 }
  0x71   : > { %v928_v32 = vld [vmem:[%s1354_s30 + $0x2d8] sm:$0xff]  ;;  %v929_v48 = vld [vmem:[%s1354_s30 + $0x2e8] sm:$0xff]  ;;  %v504_v47 = vmul.f32 %v483_v20, %v483_v20  ;;  %v505_v61 = vmul.f32 %v484_v21, %v484_v21  ;;  %v304_v55 = vadd.f32 %v303_v22, %v285_v63  ;;  %v1552_v1 = vsub.f32 %v907_v26, %v927_v31 }
  0x72   : > { %v1069_v29 = vpop.eup %1068  ;;  %v910_v60 = vld [vmem:[%s1354_s30 + $0x178] sm:$0xff]  ;;  %v1549_v62 = vld [vmem:[%s1354_s30 + $0x88] sm:$0xff]  ;;  %v1554_v3 = vsub.f32 %v908_v30, %v928_v32  ;;  %1072 = vrsqrt.f32 %v1536_v38  ;;  %v1569_v9 = vsub.f32 %v909_v44, %v929_v48  ;;  %v506_v10 = vmul.f32 %v485_v28, %v485_v28 }
  0x73   : > { %v399_v0 = vmul.f32 %v1069_v29, %v1419_v53  ;;  %v1557_v5 = vld [vmem:[%s1354_s30 + $0x98] sm:$0xff]  ;;  %v896_v57 = vld [vmem:[%s1354_s30 + $0x388] sm:$0xff]  ;;  %v1571_v15 = vmul.f32 %v885_v6, %v382_v43  ;;  %1074 = vrsqrt.f32 %v1545_v56  ;;  %v507_v22 = vmul.f32 %v486_v33, %v486_v33 }
  0x74   : > { %v895_v51 = vld [vmem:[%s1354_s30 + $0x378] sm:$0xff]  ;;  %v911_v7 = vld [vmem:[%s1354_s30 + $0x188] sm:$0xff]  ;;  %v524_v25 = vadd.f32 %v505_v61, %v504_v47  ;;  %v548_v26 = vmul.f32 %v896_v57, %v1557_v5  ;;  %v1586_v27 = vadd.f32 %v304_v55, %v1504_v4  ;;  %v508_v33 = vmul.f32 %v487_v34, %v487_v34 }
  0x75   : > { %v930_v63 = vld [vmem:[%s1354_s30 + $0x2f8] sm:$0xff]  ;;  %v931_v8 = vld [vmem:[%s1354_s30 + $0x308] sm:$0xff]  ;;  %1889 = vst [vmem:[#allocation23_spill] sm:$0xff] %v1571_v15  ;;  %v547_v6 = vmul.f32 %v895_v51, %v1549_v62  ;;  %v1591_v28 = vsel %vm400_vm1, %v1419_v53, %v399_v0  ;;  %v509_v61 = vmul.f32 %v488_v35, %v488_v35  ;;  %vm416_vm2 = vcmp.eq.f32.partialorder %v1429_v59, inf }
  0x76   : > { %v1071_v13 = vpop.eup %1070  ;;  %v912_v18 = vld [vmem:[%s1354_s30 + $0x198] sm:$0xff]  ;;  %v913_v19 = vld [vmem:[%s1354_s30 + $0x1a8] sm:$0xff]  ;;  %v1593_v29 = vsub.f32 %v910_v60, %v930_v63  ;;  %v1595_v30 = vsub.f32 %v911_v7, %v931_v8  ;;  %v525_v43 = vadd.f32 %v524_v25, %v506_v10  ;;  %v550_v55 = vmul.f32 %v1557_v5, %v548_v26 }
  0x77   : > { %v932_v20 = vld [vmem:[%s1354_s30 + $0x318] sm:$0xff]  ;;  %v933_v21 = vld [vmem:[%s1354_s30 + $0x328] sm:$0xff]  ;;  %v1604_v4 = vmul.f32 %v1071_v13, %v1429_v59  ;;  %v549_v44 = vmul.f32 %v1549_v62, %v547_v6  ;;  %v510_v7 = vmul.f32 %v489_v37, %v489_v37  ;;  %v511_v13 = vmul.f32 %v490_v50, %v490_v50 }
  0x78   : > { %v1598_v31 = vld [vmem:[%s1354_s30 + $0x8] sm:$0xff]  ;;  %v1601_v32 = vld [vmem:[%s1354_s30 + $0x18] sm:$0xff]  ;;  %v1610_v47 = vsub.f32 %v912_v18, %v932_v20  ;;  %v1612_v60 = vsub.f32 %v913_v19, %v933_v21  ;;  %v526_v34 = vadd.f32 %v525_v43, %v507_v22  ;;  %v512_v18 = vmul.f32 %v491_v54, %v491_v54 }
  0x79   : > { %1890 = vst [vmem:[#allocation24_spill] sm:$0xff] %v1598_v31  ;;  %1891 = vst [vmem:[#allocation25_spill] sm:$0xff] %v1601_v32  ;;  %v1608_v48 = vld [vmem:[%s1354_s30 + $0x28] sm:$0xff]  ;;  %v1616_v0 = vld [vmem:[%s1354_s30 + $0x38] sm:$0xff]  ;;  %v561_v10 = vmul.f32 0.071428575, %v1598_v31  ;;  %v551_v19 = vadd.f32 %v550_v55, %v549_v44  ;;  %v513_v6 = vmul.f32 %v492_v46, %v492_v46 }
  0x7a   : > { %1892 = vst [vmem:[#allocation26_spill] sm:$0xff] %v1608_v48  ;;  %1893 = vst [vmem:[#allocation27_spill] sm:$0xff] %v1616_v0  ;;  %v1619_v51 = vld [vmem:[%s1354_s30 + $0x48] sm:$0xff]  ;;  %v1622_v57 = vld [vmem:[%s1354_s30 + $0x58] sm:$0xff]  ;;  %v562_v35 = vmul.f32 0.071428575, %v1601_v32  ;;  %v527_v21 = vadd.f32 %v526_v34, %v508_v33 }
  0x7b   : > { %v1625_v63 = vld [vmem:[%s1354_s30 + $0x68] sm:$0xff]  ;;  %v1628_v8 = vld [vmem:[%s1354_s30 + $0x78] sm:$0xff]  ;;  %v563_v20 = vmul.f32 0.071428575, %v1608_v48  ;;  %v564_v37 = vmul.f32 0.071428575, %v1616_v0  ;;  %v552_v26 = vadd.f32 %v551_v19, %v1518_v16 }
  0x7c   : > { %v565_v22 = vmul.f32 0.5, %v1619_v51  ;;  %v566_v25 = vmul.f32 0.5, %v1622_v57  ;;  %v1638_v43 = vld [vmem:[%s1354_s30 + $0x1e8] sm:$0xff]  ;;  %v567_v50 = vmul.f32 0.5, %v1625_v63  ;;  %v568_v54 = vmul.f32 0.5, %v1628_v8  ;;  %v1646_v55 = vld [vmem:[%s1354_s30 + $0x1f8] sm:$0xff] }
  0x7d   : > { %1894 = vst [vmem:[#allocation28_spill] sm:$0xff] %v1638_v43  ;;  %v1641_v14 = vld [vmem:[%s1354_s30 + $0x208] sm:$0xff]  ;;  %v528_v44 = vadd.f32 %v527_v21, %v509_v61  ;;  %v1649_v33 = vld [vmem:[%s1354_s30 + $0x218] sm:$0xff]  ;;  %553 = vst [vmem:[#allocation3] sm:$0xff] %v552_v26  ;;  %vm402_vm3 = vcmp.eq.f32.partialorder %v1419_v53, 0.0  ;;  %vm393_vm4 = vcmp.eq.f32.partialorder %v1536_v38, inf }
  0x7e   : > { %v558_v34 = vsub.f32 %v1641_v14, %v1638_v43  ;;  %v569_v41 = vsub.f32 %v561_v10, %v565_v22  ;;  %v570_v46 = vsub.f32 %v562_v35, %v566_v25  ;;  %v559_v16 = vsub.f32 %v1649_v33, %v1646_v55 }
  0x7f   : > { %v571_v19 = vsub.f32 %v563_v20, %v567_v50  ;;  %v573_v17 = vadd.f32 %v565_v22, %v561_v10  ;;  %v574_v24 = vadd.f32 %v566_v25, %v562_v35  ;;  %v529_v23 = vadd.f32 %v528_v44, %v510_v7  ;;  %v1073_v21 = vpop.eup %1072 }
  0x80   : > { %v572_v0 = vsub.f32 %v564_v37, %v568_v54  ;;  %v575_v48 = vadd.f32 %v567_v50, %v563_v20  ;;  %v576_v61 = vadd.f32 %v568_v54, %v564_v37  ;;  %v579_v26 = vmax.f32 %v569_v41, %v1638_v43  ;;  %v1075_v15 = vpop.eup %1074  ;;  %v914_v54 = vld [vmem:[%s1354_s30 + $0x1b8] sm:$0xff] }
  0x81   : > { %v577_v32 = vmin.f32 %v573_v17, %v1641_v14  ;;  %v578_v31 = vmin.f32 %v574_v24, %v1641_v14  ;;  %v580_v2 = vmax.f32 %v570_v46, %v1638_v43  ;;  %v514_v7 = vmul.f32 %v1552_v1, %v1552_v1  ;;  %v934_v1 = vld [vmem:[%s1354_s30 + $0x338] sm:$0xff] }
  0x82   : > { %v530_v10 = vadd.f32 %v529_v23, %v511_v13  ;;  %v585_v35 = vmin.f32 %v575_v48, %v1649_v33  ;;  %v586_v20 = vmin.f32 %v576_v61, %v1649_v33  ;;  %v515_v37 = vmul.f32 %v1554_v3, %v1554_v3 }
  0x83   : > { %v581_v22 = vsub.f32 %v577_v32, %v579_v26  ;;  %v582_v25 = vsub.f32 %v578_v31, %v580_v2  ;;  %v587_v50 = vmax.f32 %v571_v19, %v1646_v55  ;;  %vm409_vm5 = vcmp.eq.f32.partialorder %v1545_v56, inf }
  0x84   : > { %vm418_vm6 = vcmp.eq.f32.partialorder %v1429_v59, 0.0  ;;  %v531_v23 = vadd.f32 %v530_v10, %v512_v18  ;;  %v588_v13 = vmax.f32 %v572_v0, %v1646_v55  ;;  %v595_v44 = vsub.f32 %v573_v17, %v569_v41 }
  0x85   : > { %v596_v43 = vsub.f32 %v574_v24, %v570_v46  ;;  %v560_v40 = vmul.f32 %v559_v16, %v558_v34  ;;  %v583_v45 = vmax.f32 %v581_v22, 0.0  ;;  %v589_v58 = vsub.f32 %v585_v35, %v587_v50 }
  0x86   : > { %v597_v36 = vsub.f32 %v575_v48, %v571_v19  ;;  %vm395_vm7 = vcmp.eq.f32.partialorder %v1536_v38, 0.0  ;;  %v532_v2 = vadd.f32 %v531_v23, %v513_v6  ;;  %v584_v3 = vmax.f32 %v582_v25, 0.0  ;;  %v935_v19 = vld [vmem:[%s1354_s30 + $0x348] sm:$0xff] }
  0x87   : > { %v590_v31 = vsub.f32 %v586_v20, %v588_v13  ;;  %v598_v32 = vsub.f32 %v576_v61, %v572_v0  ;;  %v306_v26 = vadd.f32 %v1586_v27, %v1509_v11  ;;  %vm411_vm8 = vcmp.eq.f32.partialorder %v1545_v56, 0.0  ;;  %v915_v27 = vld [vmem:[%s1354_s30 + $0x1c8] sm:$0xff] }
  0x88   : > { %v500_v18 = vsub.f32 %v914_v54, %v934_v1  ;;  %v591_v41 = vmax.f32 %v589_v58, 0.0  ;;  %v599_v24 = vmul.f32 %v597_v36, %v595_v44  ;;  %v516_v17 = vmul.f32 %v1569_v9, %v1569_v9 }
  0x89   : > { %v533_v48 = vadd.f32 %v532_v2, %v514_v7  ;;  %v592_v34 = vmax.f32 %v590_v31, 0.0  ;;  %v600_v46 = vmul.f32 %v598_v32, %v596_v43  ;;  %v392_v6 = vmul.f32 %v1073_v21, %v1536_v38  ;;  %v936_v21 = vld [vmem:[%s1354_s30 + $0x358] sm:$0xff]  ;;  %v1727_v32 = vld [vmem:[%s1354_s30 + $0x368] sm:$0xff] }
  0x8a   : > { %v517_v0 = vmul.f32 %v1593_v29, %v1593_v29  ;;  %v593_v16 = vmul.f32 %v591_v41, %v583_v45  ;;  %v601_v11 = vadd.f32 %v599_v24, %v560_v40  ;;  %1076 = vrsqrt.f32 %v1641_v14  ;;  %v916_v29 = vld [vmem:[%s1354_s30 + $0x1d8] sm:$0xff] }
  0x8b   : > { %v534_v61 = vadd.f32 %v533_v48, %v515_v37  ;;  %v594_v58 = vmul.f32 %v592_v34, %v584_v3  ;;  %v602_v36 = vadd.f32 %v600_v46, %v560_v40  ;;  %v307_v9 = vadd.f32 %v306_v26, %v1511_v12  ;;  %v1903_v24 = vld [vmem:[#allocation20_spill] sm:$0xff] }
  0x8c   : > { %v408_v43 = vmul.f32 %v1075_v15, %v1545_v56  ;;  %v603_v7 = vsub.f32 %v601_v11, %v593_v16  ;;  %1078 = vrsqrt.f32 %v1649_v33  ;;  %v417_v45 = vsel %vm416_vm2, %v1429_v59, %v1604_v4  ;;  %v1907_v11 = vld [vmem:[#allocation22_spill] sm:$0xff] }
  0x8d   : > { %v518_v10 = vmul.f32 %v1595_v30, %v1595_v30  ;;  %v535_v40 = vadd.f32 %v534_v61, %v516_v17  ;;  %v604_v35 = vsub.f32 %v602_v36, %v594_v58  ;;  %v1895_v12 = vand.u32 2147483648, %v1419_v53  ;;  %v1904_v17 = vld [vmem:[#allocation19_spill] sm:$0xff]  ;;  %v269_v61 = vld [vmem:[#allocation2] sm:$0xff] }
  0x8e   : > { %v412_v20 = vand.u32 2147483648, %v1545_v56  ;;  %v501_v37 = vsub.f32 %v915_v27, %v935_v19  ;;  %v605_v22 = vmul.f32 %v603_v7, %v594_v58  ;;  %v394_v4 = vsel %vm393_vm4, %v1536_v38, %v392_v6 }
  0x8f   : > { %v404_v15 = vsel %vm402_vm3, %v1895_v12, %v1591_v28  ;;  %v519_v30 = vmul.f32 %v1610_v47, %v1610_v47  ;;  %v536_v25 = vadd.f32 %v535_v40, %v517_v0  ;;  %v606_v50 = vmul.f32 %v604_v35, %v593_v16  ;;  %v1908_v35 = vld [vmem:[#allocation24_spill] sm:$0xff]  ;;  %v1909_v12 = vld [vmem:[#allocation25_spill] sm:$0xff] }
  0x90   : > { %v308_v54 = vadd.f32 %v307_v9, %v1513_v42  ;;  %v410_v53 = vsel %vm409_vm5, %v1545_v56, %v408_v43  ;;  %v1896_v28 = vand.u32 2147483648, %v1429_v59  ;;  %v502_v23 = vsub.f32 %v916_v29, %v936_v21  ;;  %v381_v42 = vld [vmem:[#allocation4] sm:$0xff] }
  0x91   : > { %v520_v13 = vmul.f32 %v1612_v60, %v1612_v60  ;;  %v521_v44 = vmul.f32 %v500_v18, %v500_v18  ;;  %v537_v2 = vadd.f32 %v536_v25, %v518_v10  ;;  %vm1718_vm9 = vcmp.gt.f32.partialorder %v605_v22, %v606_v50  ;;  %v1906_v56 = vld [vmem:[#allocation23_spill] sm:$0xff] }
  0x92   : > { %v420_v1 = vsel %vm418_vm6, %v1896_v28, %v417_v45  ;;  %v1899_v3 = vand.u32 2147483648, %v1536_v38  ;;  %v1733_v59 = vsel %vm1718_vm9, %v1622_v57, %v1619_v51  ;;  %v1739_v60 = vsel %vm1718_vm9, %v1628_v8, %v1625_v63  ;;  %v1900_v51 = vld [vmem:[#allocation18_spill] sm:$0xff]  ;;  %v1902_v8 = vld [vmem:[#allocation21_spill] sm:$0xff]  ;;  %v1912_v28 = vld [vmem:[#allocation28_spill] sm:$0xff] }
  0x93   : > { %v612_v38 = vsel %vm1718_vm9, %v1557_v5, %v1549_v62  ;;  %v413_v26 = vsel %vm411_vm8, %v412_v20, %v410_v53  ;;  %v538_v18 = vadd.f32 %v537_v2, %v519_v30  ;;  %1080 = vrsqrt.f32 %v1733_v59  ;;  %v1911_v30 = vld [vmem:[#allocation27_spill] sm:$0xff] }
  0x94   : > { %v397_v31 = vsel %vm395_vm7, %v1899_v3, %v394_v4  ;;  %v941_v41 = vadd.f32 -1.0, %v612_v38  ;;  %v1901_v57 = vsel %vm1484_vm0, %v1394_v39, %v1900_v51  ;;  %v1905_v62 = vsel %vm1484_vm0, %v1903_v24, %v1904_v17  ;;  %v1910_v4 = vld [vmem:[#allocation26_spill] sm:$0xff] }
  0x95   : > { %v386_v63 = vsub.f32 %v1901_v57, %v1416_v52  ;;  %v388_v5 = vsub.f32 %v1905_v62, %v1902_v8  ;;  %1082 = vrsqrt.f32 %v1739_v60  ;;  %v384_v48 = vadd.f32 %v1906_v56, %v381_v42  ;;  %v424_v56 = vld [vmem:[#allocation5] sm:$0xff] }
  0x96   : > { %v522_v34 = vmul.f32 %v501_v37, %v501_v37  ;;  %v539_v46 = vadd.f32 %v538_v18, %v520_v13  ;;  %v615_v6 = vmul.f32 %v941_v41, %v1727_v32  ;;  %v405_v0 = vsub.f32 %v397_v31, %v404_v15 }
  0x97   : > { %v421_v16 = vsub.f32 %v413_v26, %v420_v1  ;;  %v309_v39 = vmul.f32 %v1907_v11, %v308_v54  ;;  %v523_v52 = vmul.f32 %v502_v23, %v502_v23  ;;  %v1077_v49 = vpop.eup %1076  ;;  %v387_v36 = vmul.f32 %v386_v63, %v386_v63 }
  0x98   : > { %v540_v27 = vadd.f32 %v539_v46, %v521_v44  ;;  %v616_v19 = vmul.f32 %v941_v41, %v615_v6  ;;  %v389_v9 = vmul.f32 %v388_v5, %v388_v5  ;;  %v406_v45 = vmul.f32 %v405_v0, %v405_v0 }
  0x99   : > { %v1079_v58 = vpop.eup %1078  ;;  %v422_v29 = vmul.f32 %v421_v16, %v421_v16  ;;  %v310_v21 = vadd.f32 %v309_v39, %v269_v61  ;;  %v632_v40 = vmul.f32 %v1077_v49, %v1641_v14  ;;  %v608_v15 = vsel %vm1718_vm9, %v1909_v12, %v1908_v35 }
  0x9a   : > { %v541_v43 = vadd.f32 %v540_v27, %v522_v34  ;;  %v617_v7 = vadd.f32 %v616_v19, %v384_v48  ;;  %vm633_vm10 = vcmp.eq.f32.partialorder %v1641_v14, inf  ;;  %v648_v20 = vmul.f32 %v1079_v58, %v1649_v33 }
  0x9b   : > { %v390_v37 = vadd.f32 %v389_v9, %v387_v36  ;;  %v609_v25 = vsel %vm1718_vm9, %v1911_v30, %v1910_v4  ;;  %vm649_vm11 = vcmp.eq.f32.partialorder %v1649_v33, inf  ;;  %v423_v50 = vadd.f32 %v422_v29, %v406_v45 }
  0x9c   : > { %v542_v10 = vadd.f32 %v541_v43, %v523_v52  ;;  %618 = vst [vmem:[#allocation4] sm:$0xff] %v617_v7  ;;  %vm635_vm12 = vcmp.eq.f32.partialorder %v1641_v14, 0.0  ;;  %v636_v54 = vand.u32 2147483648, %v1641_v14  ;;  %vm651_vm13 = vcmp.eq.f32.partialorder %v1649_v33, 0.0 }
  0x9d   : > { %v619_v1 = vsub.f32 %v608_v15, %v1912_v28  ;;  %v634_v23 = vsel %vm633_vm10, %v1641_v14, %v632_v40  ;;  %v652_v13 = vand.u32 2147483648, %v1649_v33  ;;  %v621_v2 = vsub.f32 %v609_v25, %v1646_v55 }
  0x9e   : > { %v543_v22 = vmul.f32 %v1727_v32, %v542_v10  ;;  %vm626_vm14 = vcmp.eq.f32.partialorder %v1733_v59, inf  ;;  %v629_v47 = vand.u32 2147483648, %v1733_v59  ;;  %v650_v42 = vsel %vm649_vm11, %v1649_v33, %v648_v20 }
  0x9f   : > { %vm628_vm15 = vcmp.eq.f32.partialorder %v1733_v59, 0.0  ;;  %vm642_vm0 = vcmp.eq.f32.partialorder %v1739_v60, inf  ;;  %v645_v38 = vand.u32 2147483648, %v1739_v60  ;;  %v637_v26 = vsel %vm635_vm12, %v636_v54, %v634_v23 }
  0xa0   : > { %v544_v53 = vadd.f32 %v543_v22, %v310_v21  ;;  %v1081_v44 = vpop.eup %1080  ;;  %vm644_vm1 = vcmp.eq.f32.partialorder %v1739_v60, 0.0  ;;  %v426_v18 = vadd.f32 %v423_v50, %v390_v37  ;;  %v653_v51 = vsel %vm651_vm13, %v652_v13, %v650_v42 }
  0xa1   : > { %v625_v31 = vmul.f32 %v1081_v44, %v1733_v59  ;;  %v620_v57 = vmul.f32 %v619_v1, %v619_v1  ;;  %v622_v63 = vmul.f32 %v621_v2, %v621_v2  ;;  %vm425_vm2 = vcmp.gt.f32.partialorder %v1907_v11, 0.0 }
  0xa2   : > { %v1083_v3 = vpop.eup %1082  ;;  %545 = vst [vmem:[#allocation2] sm:$0xff] %v544_v53  ;;  %v427_v48 = vsel %vm425_vm2, %v426_v18, 0.0  ;;  %vm658_vm3 = vcmp.gt.f32.partialorder %v1727_v32, 0.0 }
  0xa3   : > { %v641_v55 = vmul.f32 %v1083_v3, %v1739_v60  ;;  %v627_v41 = vsel %vm626_vm14, %v1733_v59, %v625_v31  ;;  %v623_v34 = vadd.f32 %v622_v63, %v620_v57  ;;  %v428_v59 = vadd.f32 %v427_v48, %v424_v56 }
  0xa4   : > { %v630_v8 = vsel %vm628_vm15, %v629_v47, %v627_v41 }
  0xa5   : > { %v643_v24 = vsel %vm642_vm0, %v1739_v60, %v641_v55  ;;  %v638_v17 = vsub.f32 %v630_v8, %v637_v26 }
  0xa6   : > { %v646_v14 = vsel %vm644_vm1, %v645_v38, %v643_v24 }
  0xa7   : > { %v654_v62 = vsub.f32 %v646_v14, %v653_v51  ;;  %v639_v5 = vmul.f32 %v638_v17, %v638_v17 }
  0xa9   : > { %v655_v46 = vmul.f32 %v654_v62, %v654_v62 }
  0xab   : > { %v656_v6 = vadd.f32 %v655_v46, %v639_v5 }
  0xad   : > { %v659_v33 = vadd.f32 %v656_v6, %v623_v34 }
  0xae   : > { %666 = sbr.rel (%p942_p7) target bundleno = 393 (0x189), region = 36 }
  0xaf   : > { %v660_v0 = vsel %vm658_vm3, %v659_v33, 0.0 }
  0xb0   : > { %v661_v16 = vadd.f32 %v660_v0, %v428_v59 }
  0xb2   : > { %662 = vst [vmem:[#allocation5] sm:$0xff] %v661_v16 }
  0xb3   : > { %v697_v60 = vld [vmem:[#allocation4] sm:$0xff]  ;;  %v670_v11 = vld [vmem:[#allocation2] sm:$0xff]  ;;  %v683_v52 = vld [vmem:[#allocation3] sm:$0xff]  ;;  %v667_v1 = vlaneseq }
  0xb4   : > { %698 = vadd.xlane.f32.xlu1 %v697_v60  ;;  %671 = vadd.xlane.f32.xlu0 %v670_v11 }
  0xb5   : > { %v668_v23 = vand.u32 127, %v667_v1 }
  0xb7   : > { %vm669_vm4 = vcmp.eq.s32.totalorder %v668_v23, 0  ;;  %vm682_vm5 = vcmp.eq.s32.totalorder %v668_v23, 1  ;;  %vm696_vm6 = vcmp.eq.s32.totalorder %v668_v23, 2  ;;  %vm710_vm7 = vcmp.eq.s32.totalorder %v668_v23, 3 }
  0xb8   : > { %684 = vadd.xlane.f32.xlu0 %v683_v52 }
  0xb9   : > { %v711_v39 = vld [vmem:[#allocation5] sm:$0xff] }
  0xba   : > { %712 = vadd.xlane.f32.xlu1 %v711_v39 }
 0x13d   : > { %v699_v27 = vpop.xlane.xlu1 %698  ;;  %v672_v19 = vpop.xlane.xlu0 %671 }
 0x13e   : > { %v700_v49 = vrot.slane %v699_v27, 4  ;;  %v673_v61 = vrot.slane %v672_v19, 4 }
 0x140   : > { %v701_v32 = vadd.f32 %v700_v49, %v699_v27  ;;  %v674_v58 = vadd.f32 %v673_v61, %v672_v19 }
 0x141   : > { %v685_v9 = vpop.xlane.xlu0 %684 }
 0x142   : > { %v702_v43 = vrot.slane %v701_v32, 2  ;;  %v675_v7 = vrot.slane %v674_v58, 2  ;;  %v686_v29 = vrot.slane %v685_v9, 4 }
 0x143   : > { %v713_v36 = vpop.xlane.xlu1 %712 }
 0x144   : > { %v714_v45 = vrot.slane %v713_v36, 4  ;;  %v687_v10 = vadd.f32 %v686_v29, %v685_v9  ;;  %v676_v40 = vadd.f32 %v675_v7, %v674_v58  ;;  %v703_v35 = vadd.f32 %v702_v43, %v701_v32 }
 0x146   : > { %v715_v21 = vadd.f32 %v714_v45, %v713_v36  ;;  %v688_v15 = vrot.slane %v687_v10, 2  ;;  %v677_v20 = vrot.slane %v676_v40, 1  ;;  %v704_v30 = vrot.slane %v703_v35, 1 }
 0x148   : > { %v716_v12 = vrot.slane %v715_v21, 2  ;;  %v689_v22 = vadd.f32 %v688_v15, %v687_v10  ;;  %v678_v4 = vadd.f32 %v677_v20, %v676_v40  ;;  %v705_v28 = vadd.f32 %v704_v30, %v703_v35 }
 0x14a   : > { %v717_v37 = vadd.f32 %v716_v12, %v715_v21  ;;  %949 = vpush %v678_v4  ;;  %v690_v25 = vrot.slane %v689_v22, 1 }
 0x14c   : > { %v718_v50 = vrot.slane %v717_v37, 1  ;;  %v691_v54 = vadd.f32 %v690_v25, %v689_v22 }
 0x14e   : > { %v719_v53 = vadd.f32 %v718_v50, %v717_v37  ;;  %951 = vpush %v691_v54 }
 0x14f   : > { %953 = vpush %v705_v28 }
 0x150   : > { %955 = vpush %v719_v53 }
 0x17b   : > { %s950_s12 = spop %949 }
 0x17c   : > { %v680_v13 = vstv %s950_s12 }
 0x17d   : > { %v681_v2 = vsel %vm669_vm4, %v680_v13, 0.0 }
 0x17f   : > { %s952_s25 = spop %951 }
 0x180   : > { %v693_v44 = vstv %s952_s25  ;;  %s954_s9 = spop %953 }
 0x181   : > { %v694_v47 = vsel %vm682_vm5, %v693_v44, 0.0  ;;  %v707_v42 = vstv %s954_s9  ;;  %s956_s28 = spop %955 }
 0x182   : > { %v695_v3 = vadd.f32 %v694_v47, %v681_v2  ;;  %v721_v31 = vstv %s956_s28  ;;  %v708_v38 = vsel %vm696_vm6, %v707_v42, 0.0 }
 0x183   : > { %v722_v55 = vsel %vm710_vm7, %v721_v31, 0.0 }
 0x184   : > { %v709_v26 = vadd.f32 %v708_v38, %v695_v3 }
 0x186   : > { %v723_v18 = vadd.f32 %v722_v55, %v709_v26 }
 0x188   : > { %724 = vst [vmem:[%s1363_s24] sm:$0x1] %v723_v18 }
 0x189 PF: > { %s943_s29 = sshll.u32 %s1192_s13, 4  ;;  %s738_s18 = sshll.u32 %s1363_s24, 4  ;;  %s739_s18 = int_to_ptr.vmem [resolvable:$true] %s738_s18 }
 0x18a   : > { %s736_s21 = scalar_lea.hbm %s1860_s1, %s943_s29  ;;  %s726_s17 = scalar_lea.sflag [#allocation8], %s175_s20 }
 0x18b   : > { %s1084_s26 = scalar_lea.vmem %s739_s18, 16  ;;  %s1213_s15 = smov [#allocation9]  }
 0x18c   : > { %p1085_p8 = scmp.ne.s32.totalorder %s739_s18, %s1084_s26  ;;  %s1088_s19 = sshll.u32 %s1213_s15, 4  ;;  %s1089_s19 = int_to_ptr.vmem [resolvable:$false] %s1088_s19 }
 0x18d   : > { %s1090_s27 = scalar_lea.vmem %s1089_s19, 32  ;;  %p1091_p11 = scmp.lt.s32.totalorder %s739_s18, %s1089_s19 }
 0x18e   : > { %p1086_p9 = pnand %p1085_p8, %p1317_p12  ;;  %p1092_p13 = scmp.lt.s32.totalorder %s1090_s27, %s1084_s26 }
 0x190   : > { %p1087_p10 = pneg %p1086_p9  ;;  %p1093_p0 = por %p1092_p13, %p1091_p11 }
 0x192   : > { %p1094_p2 = pnand %p1093_p0, %p1087_p10 }
 0x194   : > { %1097 = shalt.err (!%p1094_p2)
}
 0x195   : > { %s1098_s13 = scalar_lea.hbm %s736_s21, 16  ;;  %s1102_s24 = scalar_lea.hbm %s1860_s1, 32 }
 0x196   : > { %p1099_p3 = scmp.ne.s32.totalorder %s736_s21, %s1098_s13  ;;  %p1103_p5 = scmp.lt.s32.totalorder %s736_s21, %s1860_s1 }
 0x197   : > { %p1104_p7 = scmp.lt.s32.totalorder %s1102_s24, %s1098_s13 }
 0x198   : > { %p1100_p4 = pnand %p1099_p3, %p1317_p12 }
 0x199   : > { %p1105_p8 = por %p1104_p7, %p1103_p5 }
 0x19a   : > { %p1101_p6 = pneg %p1100_p4 }
 0x19c   : > { %p1106_p9 = pnand %p1105_p8, %p1101_p6 }
 0x19e   : > { %1109 = shalt.err (!%p1106_p9)
}
 0x19f   : > { %966 = dma.vmem_to_hbm [thread:$0]  (%p1317_p12), %s739_s18, 16, %s736_s21, %s726_s17  }
 0x1a0 PF: > { %p972_p10 = scmp.ge.s32.totalorder %s1204_s16, 2  ;;  %s750_s9 = sand.u32 1, %s1164_s6  }
 0x1a1   : > { %s751_s28 = scalar_lea.sflag [#allocation8], %s750_s9 }
 0x1a2   : > { %p969_p11 = pnand %p972_p10, %p1325_p1 }
 0x1a4   : > { %p970_p13 = pneg %p969_p11 }
 0x1a6   : > { %1159 = dma.done.wait (%p970_p13), %s751_s28, 16  }
 0x1a7   : > { %1161 = vsyncadd (%p970_p13), %s751_s28, 4294967280  ;;  %s17_s16 = sadd.s32 1, %s1204_s16   ;;  %s1913_s13 = sld [smem:[#allocation15_spill]] }
 0x1a8   : > { %p14_p0 = scmp.ge.s32.totalorder %s17_s16, 6   ;;  %s1914_s4 = sld [smem:[#allocation16_spill]] }
 0x1a9   : > { %s1915_s15 = sld [smem:[#allocation17_spill]]  ;;  %s1916_s6 = smov %s1168_s7 }
 0x1aa   : > { %s1917_s7 = smov %s1172_s8  ;;  %s1918_s8 = smov %s1312_s2 }
 0x1ab   : > { %s1919_s9 = smov %s1180_s10  ;;  %s1920_s10 = smov %s1184_s11 }
 0x1ac   : > { %s1921_s11 = smov %s1315_s3  ;;  %s1922_s12 = smov %s1196_s14 }
 0x1ad   :  { %16 = sbr.rel (!%p14_p0) target bundleno = 9 (0x9), region = 91 }
 0x1ae   : > { %s1923_s14 = smov %s1914_s4 }
 0x1b2   :  { %755 = vsyncpa [#allocation7], 1 }
 0x1b3   :  { %757 = vsyncpa [#allocation7 + $0x1], 1 }
 0x1b4   :  { %758 = vsyncpa [#allocation8], 1 }
 0x1b5   :  { %760 = vsyncpa [#allocation8 + $0x1], 1 }

</bundles_post_ra>
